<compile_context>
chip_gen: v7x
topology: tpu7x:2x2x1
jax: 0.10.0
libtpu: 0.0.40
codegen_flags: <defaults>
</compile_context>

<pallas_src>
import jax
import jax.numpy as jnp
from jax.experimental import pallas as pl
from jax.experimental.pallas import tpu as pltpu

_BN_EPS = 1e-5


# ------------------------------ fused kernel --------------------------------
def _make_kernel(BB, T, C, K, NC, D, dilations, dot_dtype):
    """Kernel body = full TIMNET forward for BB batch elements (M = BB*T rows)."""
    M = BB * T

    def kernel(x_ref, w0_ref, b0_ref, w_ref, sh_ref, wc_ref, bc_ref, wl_ref, o_ref):
        x = x_ref[...].reshape(M, C)                      # (M, C) f32, batch folded in M

        # hoisted row -> time-within-sample index, used by every shift mask
        t_idx = jax.lax.broadcasted_iota(jnp.int32, (M, 1), 0) % T

        def shifted(h, s, causal):
            # causal:      out[b, t] = h[b, t - s]   (zeros for t < s)
            # anti-causal: out[b, t] = h[b, t + s]   (zeros for t >= T - s)
            if s == 0:
                return h
            if s >= T:
                return jnp.zeros_like(h)
            if causal:
                r = pltpu.roll(h, s, 0)                   # XLU sublane rotation
                return jnp.where(t_idx >= s, r, 0.0)      # rows that wrapped across
            r = pltpu.roll(h, M - s, 0)                   # samples are masked to 0
            return jnp.where(t_idx < T - s, r, 0.0)

        def conv_bn_relu(h, layer, dil, causal):
            # all K taps fused into one (M, K*C) @ (K*C, C) MXU matmul
            parts = [shifted(h, (K - 1 - k) * dil, causal) for k in range(K)]
            op = jnp.concatenate(parts, axis=1).astype(dot_dtype)
            y = jnp.dot(op, w_ref[layer], preferred_element_type=jnp.float32)
            # BN scale already folded into the weights; only shift (+bias) + ReLU left
            return jnp.maximum(y + sh_ref[layer], 0.0)

        # shared CausalConv1d(kernel_size=1) (pointwise)
        h0 = jnp.dot(x.astype(dot_dtype), w0_ref[...],
                     preferred_element_type=jnp.float32) + b0_ref[...]

        # accumulate the WeightLayer output directly: g = sum_i wl[i]/T * sum_t(skip_i)
        g = jnp.zeros((BB, C), jnp.float32)
        for direction in range(2):             # 0: forward (causal), 1: backward (anti-causal)
            causal = direction == 0
            h = h0
            for i, dil in enumerate(dilations):
                base = (direction * D + i) * 2
                y = conv_bn_relu(h, base + 0, dil, causal)
                # TODO(synk): SpatialDropout1D is stochastic; eval mode => identity.
                y = conv_bn_relu(y, base + 1, dil, causal)
                h = h * jax.nn.sigmoid(y)      # gated residual (Temporal_Aware_Block)
                # wl_ref holds the WeightLayer kernel with 1/T folded in (SMEM scalar)
                g = g + jnp.sum(h.reshape(BB, T, C), axis=1) * wl_ref[i]

        # classifier + log_softmax, one lane-dense (BB, NC) store per grid step
        logits = jnp.dot(g, wc_ref[...], preferred_element_type=jnp.float32) + bc_ref[...]
        mx = jnp.max(logits, axis=-1, keepdims=True)
        lse = mx + jnp.log(jnp.sum(jnp.exp(logits - mx), axis=-1, keepdims=True))
        o_ref[0] = logits - lse

    return kernel


def _auto_grid_steps(batch):
    """1 step (whole batch in M) on single-TC chips (v5e/v6e); 2 on v7x."""
    if batch >= 2 and batch % 2 == 0:
        try:
            kind = jax.devices()[0].device_kind.lower()
        except Exception:
            kind = ""
        if "v7" in kind or "7x" in kind:
            return 2
    return 1


def timnet_forward(x, params, dilations, grid_steps=None):
    """x: (B, T, C) -- the PyTorch model input before its internal permute."""
    B, T, C = x.shape
    D = len(dilations)
    K = params["K"]
    NC = params["wc_t"].shape[1]
    L, KC, _ = params["w_packed"].shape       # L = 2*D*2 conv layers, KC = K*C
    dot_dtype = params["w_packed"].dtype

    G = grid_steps if grid_steps is not None else _auto_grid_steps(B)
    if B % G != 0:
        G = 1
    BB = B // G

    # advisory cost estimate for XLA scheduling around the custom call
    M_total = B * T
    flops = (2 * M_total * C * C                       # conv1x1
             + L * 2 * M_total * KC * C                # packed dilated convs
             + 2 * B * C * NC                          # classifier
             + 2 * D * 6 * M_total * C)                # shift/relu/gate/sum (approx)
    transcendentals = 2 * D * M_total * C + B * (NC + 1)
    bytes_accessed = (4 * (x.size + B * NC + params["shift"].size + params["b0"].size
                           + params["wc_t"].size + params["bc"].size + D)
                      + 2 * (params["w_packed"].size + params["w0"].size))

    kern = _make_kernel(BB, T, C, K, NC, D, tuple(dilations), dot_dtype)
    out = pl.pallas_call(
        kern,
        out_shape=jax.ShapeDtypeStruct((G, BB, NC), jnp.float32),
        grid=(G,),
        in_specs=[
            pl.BlockSpec((BB, T, C), lambda s: (s, 0, 0)),          # x slab per step
            pl.BlockSpec((C, C), lambda s: (0, 0)),                 # conv1x1 W^T (bf16)
            pl.BlockSpec((1, C), lambda s: (0, 0)),                 # conv1x1 bias
            pl.BlockSpec((L, KC, C), lambda s: (0, 0, 0)),          # packed conv weights
            pl.BlockSpec((L, 1, C), lambda s: (0, 0, 0)),           # folded BN shifts
            pl.BlockSpec((C, NC), lambda s: (0, 0)),                # classifier W^T
            pl.BlockSpec((1, NC), lambda s: (0, 0)),                # classifier bias
            pl.BlockSpec(memory_space=pltpu.MemorySpace.SMEM),      # WeightLayer scalars
        ],
        out_specs=pl.BlockSpec((1, BB, NC), lambda s: (s, 0, 0)),
        compiler_params=pltpu.CompilerParams(dimension_semantics=("parallel",)),
        cost_estimate=pl.CostEstimate(flops=int(flops),
                                      transcendentals=int(transcendentals),
                                      bytes_accessed=int(bytes_accessed)),
    )(x, params["w0"], params["b0"], params["w_packed"], params["shift"],
      params["wc_t"], params["bc"], params["wl"])
    return out.reshape(B, NC)


# ------------------------------ parameters ----------------------------------
def init_raw_params(key, C, K, D, NC):
    """Raw PyTorch-layout parameters (conv W (C_out, C_in, K), BN stats, ...)."""
    keys = jax.random.split(key, 256)
    it = iter(keys)

    def nrm(shape, scale=0.3):
        return scale * jax.random.normal(next(it), shape, jnp.float32)

    convs = []
    # layer order: idx = (direction*D + block)*2 + conv_layer   (dir 0 = temporal_blocks)
    for _ in range(2 * D * 2):
        convs.append(dict(
            W=nrm((C, C, K)), b=nrm((C,), 0.1),
            gamma=1.0 + nrm((C,), 0.1), beta=nrm((C,), 0.1),
            mean=nrm((C,), 0.1),
            var=1.0 + 0.1 * jax.random.uniform(next(it), (C,), jnp.float32)))
    return {
        "w0": nrm((C, C, 1)), "b0": nrm((C,), 0.1),       # shared CausalConv1d(k=1)
        "convs": convs,
        "wl": jax.random.normal(next(it), (D, 1), jnp.float32),   # WeightLayer kernel
        "wc": nrm((NC, C)), "bc": nrm((NC,), 0.1),        # classifier Linear
    }


def _fold_scale(p):
    """BN eval-mode scale/shift; scale folded into the per-tap conv weights."""
    g = p["gamma"] * jax.lax.rsqrt(p["var"] + _BN_EPS)
    w_taps = jnp.transpose(p["W"], (2, 1, 0)) * g[None, None, :]   # (K, C_in, C_out)
    shift = (p["b"] - p["mean"]) * g + p["beta"]                   # (C_out,)
    return w_taps, shift


def prepare_params(raw, T, dot_dtype=jnp.bfloat16):
    """Pack / fold raw params into the kernel's layout."""
    C = raw["w0"].shape[0]
    K = raw["convs"][0]["W"].shape[2]
    w_list, sh_list = [], []
    for p in raw["convs"]:
        w_taps, shift = _fold_scale(p)
        w_list.append(w_taps.reshape(K * C, C))           # taps stacked along rows
        sh_list.append(shift.reshape(1, C))
    return {
        "w0": jnp.transpose(raw["w0"][:, :, 0]).astype(dot_dtype),   # (C_in, C_out)
        "b0": raw["b0"].reshape(1, C),
        "w_packed": jnp.stack(w_list).astype(dot_dtype),  # (2*D*2, K*C, C)
        "shift": jnp.stack(sh_list),                      # (2*D*2, 1, C) f32
        "wl": (raw["wl"][:, 0] / T).astype(jnp.float32),  # (D,) with 1/T folded in
        "wc_t": jnp.transpose(raw["wc"]),                 # (C, NC)
        "bc": raw["bc"].reshape(1, -1),
        "K": K,
    }


# ------------------------ pure-JAX reference (PyTorch graph) -----------------
def timnet_reference(x, raw, dilations, dot_dtype=jnp.float32):
    """Mirrors the PyTorch graph literally (explicit torch.flip backward branch,
    per-tap padded causal convs, eval-mode BN, dropout = identity).  `dot_dtype`
    selects the matmul operand precision so the bf16 kernel can be checked
    tightly; jnp.float32 gives the exact full-precision math."""
    B, T, C = x.shape
    D = len(dilations)

    def causal_conv(h, w_taps, dil):
        Kk = w_taps.shape[0]
        pad = (Kk - 1) * dil
        hp = jnp.concatenate([jnp.zeros((B, pad, C), h.dtype), h], axis=1)
        out = jnp.zeros((B, T, C), jnp.float32)
        for k in range(Kk):
            xs = hp[:, k * dil:k * dil + T, :]
            out = out + jnp.einsum("btc,cd->btd", xs.astype(dot_dtype),
                                   w_taps[k].astype(dot_dtype),
                                   preferred_element_type=jnp.float32)
        return out

    def run_dir(inp, direction):
        w0 = jnp.transpose(raw["w0"][:, :, 0])
        h = jnp.einsum("btc,cd->btd", inp.astype(dot_dtype), w0.astype(dot_dtype),
                       preferred_element_type=jnp.float32) + raw["b0"][None, None, :]
        skips = []
        for i, dil in enumerate(dilations):
            y = h
            for layer in range(2):
                p = raw["convs"][(direction * D + i) * 2 + layer]
                w_taps, shift = _fold_scale(p)
                y = causal_conv(y, w_taps, dil)
                y = jnp.maximum(y + shift[None, None, :], 0.0)
            h = h * jax.nn.sigmoid(y)
            skips.append(h)
        return skips

    fwd = run_dir(x, 0)
    bwd = run_dir(x[:, ::-1, :], 1)                       # torch.flip over time
    g = jnp.zeros((B, C), jnp.float32)
    for i in range(D):
        g = g + jnp.mean(fwd[i] + bwd[i], axis=1) * raw["wl"][i, 0]
    logits = g @ jnp.transpose(raw["wc"]) + raw["bc"][None, :]
    return jax.nn.log_softmax(logits, axis=-1)


# ----------------------------------- main ------------------------------------
if __name__ == "__main__":
    B, T, C = 2, 16, 8        # batch, time steps, nb_filters (== datashape[1])
    D = 4                     # "dilations" -> dilation factors 1, 2, 4, 8
    K = 2                     # kernel_size
    NC = 8                    # num_classes

    key = jax.random.PRNGKey(0)
    kx, kp = jax.random.split(key)
    x = jax.random.normal(kx, (B, T, C), jnp.float32)
    raw = init_raw_params(kp, C, K, D, NC)
    params = prepare_params(raw, T, dot_dtype=jnp.bfloat16)
    dilation_list = [2 ** i for i in range(D)]

    out = jax.block_until_ready(timnet_forward(x, params, dilation_list))

    assert out.shape == (B, NC)
    assert bool(jnp.all(jnp.isfinite(out)))
    # log_softmax rows must exponentiate to ~1
    assert bool(jnp.allclose(jnp.exp(out).sum(axis=-1), 1.0, atol=1e-4))
    # tight check vs a reference with matched matmul precision (bf16 MXU operands)
    ref_bf16 = timnet_reference(x, raw, dilation_list, dot_dtype=jnp.bfloat16)
    assert bool(jnp.allclose(out, ref_bf16, atol=5e-3, rtol=5e-3))
    # loose sanity check vs the literal full-f32 PyTorch math (bf16 matmul drift)
    ref_f32 = timnet_reference(x, raw, dilation_list, dot_dtype=jnp.float32)
    assert bool(jnp.allclose(out, ref_f32, atol=1e-1, rtol=1e-1))
    print("KERNEL_OK")
</pallas_src>

<mosaic_0001>
module attributes {stable_mosaic.version = 11 : i64} {
  func.func @kernel(%arg0: i32, %arg1: memref<2x16x8xf32, #tpu.memory_space<vmem>>, %arg2: memref<8x8xbf16, #tpu.memory_space<vmem>>, %arg3: memref<1x8xf32, #tpu.memory_space<vmem>>, %arg4: memref<16x16x8xbf16, #tpu.memory_space<vmem>>, %arg5: memref<16x1x8xf32, #tpu.memory_space<vmem>>, %arg6: memref<8x8xf32, #tpu.memory_space<vmem>>, %arg7: memref<1x8xf32, #tpu.memory_space<vmem>>, %arg8: memref<4xf32, #tpu.memory_space<smem>>, %arg9: memref<1x2x8xf32, #tpu.memory_space<vmem>>) attributes {dimension_semantics = [#tpu.dimension_semantics<parallel>], iteration_bounds = array<i64: 1>, scalar_prefetch = 0 : i64, scratch_operands = 0 : i64, tpu.core_type = #tpu.core_type<tc>, window_params = [{transform_indices = @transform_0, window_bounds = array<i64: 2, 16, 8>}, {pipeline_mode = #tpu.pipeline_mode<synchronous>, transform_indices = @transform_1, window_bounds = array<i64: 8, 8>}, {pipeline_mode = #tpu.pipeline_mode<synchronous>, transform_indices = @transform_2, window_bounds = array<i64: 1, 8>}, {pipeline_mode = #tpu.pipeline_mode<synchronous>, transform_indices = @transform_3, window_bounds = array<i64: 16, 16, 8>}, {pipeline_mode = #tpu.pipeline_mode<synchronous>, transform_indices = @transform_4, window_bounds = array<i64: 16, 1, 8>}, {pipeline_mode = #tpu.pipeline_mode<synchronous>, transform_indices = @transform_5, window_bounds = array<i64: 8, 8>}, {pipeline_mode = #tpu.pipeline_mode<synchronous>, transform_indices = @transform_6, window_bounds = array<i64: 1, 8>}, {transform_indices = @transform_7, window_bounds = array<i64: 4>}, {transform_indices = @transform_8, window_bounds = array<i64: 1, 2, 8>}]} {
    %c0 = arith.constant 0 : index
    %c0_0 = arith.constant 0 : index
    %c0_1 = arith.constant 0 : index
    %0 = vector.load %arg1[%c0, %c0_0, %c0_1] : memref<2x16x8xf32, #tpu.memory_space<vmem>>, vector<2x16x8xf32>
    %1 = vector.shape_cast %0 : vector<2x16x8xf32> to vector<32x8xf32>
    %2 = tpu.iota {dimensions = array<i32: 0>} : vector<32x1xi32>
    %c16_i32 = arith.constant 16 : i32
    %c0_i32 = arith.constant 0 : i32
    %3 = arith.cmpi eq, %c16_i32, %c0_i32 : i32
    %c1_i32 = arith.constant 1 : i32
    %4 = arith.select %3, %c1_i32, %c16_i32 : i32
    %5 = vector.broadcast %4 : i32 to vector<32x1xi32>
    %6 = arith.remsi %2, %5 : vector<32x1xi32>
    %c0_i32_2 = arith.constant 0 : i32
    %7 = vector.broadcast %c0_i32_2 : i32 to vector<32x1xi32>
    %8 = arith.cmpi ne, %6, %7 : vector<32x1xi32>
    %c0_i32_3 = arith.constant 0 : i32
    %9 = vector.broadcast %c0_i32_3 : i32 to vector<32x1xi32>
    %10 = arith.cmpi slt, %6, %9 : vector<32x1xi32>
    %c0_i32_4 = arith.constant 0 : i32
    %11 = arith.cmpi slt, %4, %c0_i32_4 : i32
    %12 = vector.broadcast %11 : i1 to vector<32x1xi1>
    %13 = vector.broadcast %12 : vector<32x1xi1> to vector<32x1xi1>
    %14 = arith.xori %10, %13 : vector<32x1xi1>
    %15 = arith.andi %14, %8 : vector<32x1xi1>
    %16 = vector.broadcast %4 : i32 to vector<32x1xi32>
    %17 = arith.addi %6, %16 : vector<32x1xi32>
    %18 = arith.select %15, %17, %6 : vector<32x1xi1>, vector<32x1xi32>
    %19 = arith.truncf %1 : vector<32x8xf32> to vector<32x8xbf16>
    %c0_5 = arith.constant 0 : index
    %c0_6 = arith.constant 0 : index
    %20 = vector.load %arg2[%c0_5, %c0_6] : memref<8x8xbf16, #tpu.memory_space<vmem>>, vector<8x8xbf16>
    %cst = arith.constant dense<0.000000e+00> : vector<32x8xf32>
    %21 = tpu.matmul %19, %20, %cst {dimension_numbers = #tpu.dot_dimension_numbers<[1], [0], [0], [1], [0, 0, 1, 1], [], []>} : vector<32x8xbf16>, vector<8x8xbf16>, vector<32x8xf32> -> vector<32x8xf32>
    %c0_7 = arith.constant 0 : index
    %c0_8 = arith.constant 0 : index
    %22 = vector.load %arg3[%c0_7, %c0_8] : memref<1x8xf32, #tpu.memory_space<vmem>>, vector<1x8xf32>
    %23 = vector.broadcast %22 : vector<1x8xf32> to vector<32x8xf32>
    %24 = arith.addf %21, %23 : vector<32x8xf32>
    %cst_9 = arith.constant 0.000000e+00 : f32
    %25 = vector.broadcast %cst_9 : f32 to vector<2x8xf32>
    %c1_i32_10 = arith.constant 1 : i32
    %26 = tpu.dynamic_rotate %24 by %c1_i32_10 dim 0 : vector<32x8xf32>, i32 -> vector<32x8xf32>
    %c1_i32_11 = arith.constant 1 : i32
    %27 = vector.broadcast %c1_i32_11 : i32 to vector<32x1xi32>
    %28 = arith.cmpi sge, %18, %27 : vector<32x1xi32>
    %cst_12 = arith.constant 0.000000e+00 : f32
    %29 = vector.shape_cast %28 : vector<32x1xi1> to vector<32x1xi1>
    %30 = vector.broadcast %29 : vector<32x1xi1> to vector<32x8xi1>
    %31 = vector.broadcast %cst_12 : f32 to vector<32x8xf32>
    %32 = arith.select %30, %26, %31 : vector<32x8xi1>, vector<32x8xf32>
    %33 = tpu.concatenate %32, %24 in 1 : vector<32x8xf32>, vector<32x8xf32> -> vector<32x16xf32>
    %34 = arith.truncf %33 : vector<32x16xf32> to vector<32x16xbf16>
    %c0_13 = arith.constant 0 : index
    %c0_14 = arith.constant 0 : index
    %c0_15 = arith.constant 0 : index
    %35 = vector.load %arg4[%c0_13, %c0_14, %c0_15] : memref<16x16x8xbf16, #tpu.memory_space<vmem>>, vector<1x16x8xbf16>
    %36 = vector.shape_cast %35 : vector<1x16x8xbf16> to vector<16x8xbf16>
    %cst_16 = arith.constant dense<0.000000e+00> : vector<32x8xf32>
    %37 = tpu.matmul %34, %36, %cst_16 {dimension_numbers = #tpu.dot_dimension_numbers<[1], [0], [0], [1], [0, 0, 1, 1], [], []>} : vector<32x16xbf16>, vector<16x8xbf16>, vector<32x8xf32> -> vector<32x8xf32>
    %c0_17 = arith.constant 0 : index
    %c0_18 = arith.constant 0 : index
    %c0_19 = arith.constant 0 : index
    %38 = vector.load %arg5[%c0_17, %c0_18, %c0_19] : memref<16x1x8xf32, #tpu.memory_space<vmem>>, vector<1x1x8xf32>
    %39 = vector.shape_cast %38 : vector<1x1x8xf32> to vector<1x8xf32>
    %40 = vector.broadcast %39 : vector<1x8xf32> to vector<32x8xf32>
    %41 = arith.addf %37, %40 : vector<32x8xf32>
    %cst_20 = arith.constant 0.000000e+00 : f32
    %42 = vector.broadcast %cst_20 : f32 to vector<32x8xf32>
    %43 = arith.maximumf %41, %42 : vector<32x8xf32>
    %c1_i32_21 = arith.constant 1 : i32
    %44 = tpu.dynamic_rotate %43 by %c1_i32_21 dim 0 : vector<32x8xf32>, i32 -> vector<32x8xf32>
    %c1_i32_22 = arith.constant 1 : i32
    %45 = vector.broadcast %c1_i32_22 : i32 to vector<32x1xi32>
    %46 = arith.cmpi sge, %18, %45 : vector<32x1xi32>
    %cst_23 = arith.constant 0.000000e+00 : f32
    %47 = vector.shape_cast %46 : vector<32x1xi1> to vector<32x1xi1>
    %48 = vector.broadcast %47 : vector<32x1xi1> to vector<32x8xi1>
    %49 = vector.broadcast %cst_23 : f32 to vector<32x8xf32>
    %50 = arith.select %48, %44, %49 : vector<32x8xi1>, vector<32x8xf32>
    %51 = tpu.concatenate %50, %43 in 1 : vector<32x8xf32>, vector<32x8xf32> -> vector<32x16xf32>
    %52 = arith.truncf %51 : vector<32x16xf32> to vector<32x16xbf16>
    %c1 = arith.constant 1 : index
    %c0_24 = arith.constant 0 : index
    %c0_25 = arith.constant 0 : index
    %53 = vector.load %arg4[%c1, %c0_24, %c0_25] : memref<16x16x8xbf16, #tpu.memory_space<vmem>>, vector<1x16x8xbf16>
    %54 = vector.shape_cast %53 : vector<1x16x8xbf16> to vector<16x8xbf16>
    %cst_26 = arith.constant dense<0.000000e+00> : vector<32x8xf32>
    %55 = tpu.matmul %52, %54, %cst_26 {dimension_numbers = #tpu.dot_dimension_numbers<[1], [0], [0], [1], [0, 0, 1, 1], [], []>} : vector<32x16xbf16>, vector<16x8xbf16>, vector<32x8xf32> -> vector<32x8xf32>
    %c1_27 = arith.constant 1 : index
    %c0_28 = arith.constant 0 : index
    %c0_29 = arith.constant 0 : index
    %56 = vector.load %arg5[%c1_27, %c0_28, %c0_29] : memref<16x1x8xf32, #tpu.memory_space<vmem>>, vector<1x1x8xf32>
    %57 = vector.shape_cast %56 : vector<1x1x8xf32> to vector<1x8xf32>
    %58 = vector.broadcast %57 : vector<1x8xf32> to vector<32x8xf32>
    %59 = arith.addf %55, %58 : vector<32x8xf32>
    %cst_30 = arith.constant 0.000000e+00 : f32
    %60 = vector.broadcast %cst_30 : f32 to vector<32x8xf32>
    %61 = arith.maximumf %59, %60 : vector<32x8xf32>
    %62 = arith.negf %61 : vector<32x8xf32>
    %63 = math.exp %62 : vector<32x8xf32>
    %cst_31 = arith.constant 1.000000e+00 : f32
    %64 = vector.broadcast %cst_31 : f32 to vector<32x8xf32>
    %65 = arith.addf %64, %63 : vector<32x8xf32>
    %66 = arith.divf %64, %65 : vector<32x8xf32>
    %67 = arith.mulf %24, %66 : vector<32x8xf32>
    %68 = vector.shape_cast %67 : vector<32x8xf32> to vector<2x16x8xf32>
    %cst_32 = arith.constant dense<0.000000e+00> : vector<2x8xf32>
    %69 = vector.multi_reduction <add>, %68, %cst_32 [1] : vector<2x16x8xf32> to vector<2x8xf32>
    %c0_33 = arith.constant 0 : index
    %70 = memref.load %arg8[%c0_33] : memref<4xf32, #tpu.memory_space<smem>>
    %71 = vector.broadcast %70 : f32 to vector<2x8xf32>
    %72 = arith.mulf %69, %71 : vector<2x8xf32>
    %73 = arith.addf %25, %72 : vector<2x8xf32>
    %c2_i32 = arith.constant 2 : i32
    %74 = tpu.dynamic_rotate %67 by %c2_i32 dim 0 : vector<32x8xf32>, i32 -> vector<32x8xf32>
    %c2_i32_34 = arith.constant 2 : i32
    %75 = vector.broadcast %c2_i32_34 : i32 to vector<32x1xi32>
    %76 = arith.cmpi sge, %18, %75 : vector<32x1xi32>
    %cst_35 = arith.constant 0.000000e+00 : f32
    %77 = vector.shape_cast %76 : vector<32x1xi1> to vector<32x1xi1>
    %78 = vector.broadcast %77 : vector<32x1xi1> to vector<32x8xi1>
    %79 = vector.broadcast %cst_35 : f32 to vector<32x8xf32>
    %80 = arith.select %78, %74, %79 : vector<32x8xi1>, vector<32x8xf32>
    %81 = tpu.concatenate %80, %67 in 1 : vector<32x8xf32>, vector<32x8xf32> -> vector<32x16xf32>
    %82 = arith.truncf %81 : vector<32x16xf32> to vector<32x16xbf16>
    %c2 = arith.constant 2 : index
    %c0_36 = arith.constant 0 : index
    %c0_37 = arith.constant 0 : index
    %83 = vector.load %arg4[%c2, %c0_36, %c0_37] : memref<16x16x8xbf16, #tpu.memory_space<vmem>>, vector<1x16x8xbf16>
    %84 = vector.shape_cast %83 : vector<1x16x8xbf16> to vector<16x8xbf16>
    %cst_38 = arith.constant dense<0.000000e+00> : vector<32x8xf32>
    %85 = tpu.matmul %82, %84, %cst_38 {dimension_numbers = #tpu.dot_dimension_numbers<[1], [0], [0], [1], [0, 0, 1, 1], [], []>} : vector<32x16xbf16>, vector<16x8xbf16>, vector<32x8xf32> -> vector<32x8xf32>
    %c2_39 = arith.constant 2 : index
    %c0_40 = arith.constant 0 : index
    %c0_41 = arith.constant 0 : index
    %86 = vector.load %arg5[%c2_39, %c0_40, %c0_41] : memref<16x1x8xf32, #tpu.memory_space<vmem>>, vector<1x1x8xf32>
    %87 = vector.shape_cast %86 : vector<1x1x8xf32> to vector<1x8xf32>
    %88 = vector.broadcast %87 : vector<1x8xf32> to vector<32x8xf32>
    %89 = arith.addf %85, %88 : vector<32x8xf32>
    %cst_42 = arith.constant 0.000000e+00 : f32
    %90 = vector.broadcast %cst_42 : f32 to vector<32x8xf32>
    %91 = arith.maximumf %89, %90 : vector<32x8xf32>
    %c2_i32_43 = arith.constant 2 : i32
    %92 = tpu.dynamic_rotate %91 by %c2_i32_43 dim 0 : vector<32x8xf32>, i32 -> vector<32x8xf32>
    %c2_i32_44 = arith.constant 2 : i32
    %93 = vector.broadcast %c2_i32_44 : i32 to vector<32x1xi32>
    %94 = arith.cmpi sge, %18, %93 : vector<32x1xi32>
    %cst_45 = arith.constant 0.000000e+00 : f32
    %95 = vector.shape_cast %94 : vector<32x1xi1> to vector<32x1xi1>
    %96 = vector.broadcast %95 : vector<32x1xi1> to vector<32x8xi1>
    %97 = vector.broadcast %cst_45 : f32 to vector<32x8xf32>
    %98 = arith.select %96, %92, %97 : vector<32x8xi1>, vector<32x8xf32>
    %99 = tpu.concatenate %98, %91 in 1 : vector<32x8xf32>, vector<32x8xf32> -> vector<32x16xf32>
    %100 = arith.truncf %99 : vector<32x16xf32> to vector<32x16xbf16>
    %c3 = arith.constant 3 : index
    %c0_46 = arith.constant 0 : index
    %c0_47 = arith.constant 0 : index
    %101 = vector.load %arg4[%c3, %c0_46, %c0_47] : memref<16x16x8xbf16, #tpu.memory_space<vmem>>, vector<1x16x8xbf16>
    %102 = vector.shape_cast %101 : vector<1x16x8xbf16> to vector<16x8xbf16>
    %cst_48 = arith.constant dense<0.000000e+00> : vector<32x8xf32>
    %103 = tpu.matmul %100, %102, %cst_48 {dimension_numbers = #tpu.dot_dimension_numbers<[1], [0], [0], [1], [0, 0, 1, 1], [], []>} : vector<32x16xbf16>, vector<16x8xbf16>, vector<32x8xf32> -> vector<32x8xf32>
    %c3_49 = arith.constant 3 : index
    %c0_50 = arith.constant 0 : index
    %c0_51 = arith.constant 0 : index
    %104 = vector.load %arg5[%c3_49, %c0_50, %c0_51] : memref<16x1x8xf32, #tpu.memory_space<vmem>>, vector<1x1x8xf32>
    %105 = vector.shape_cast %104 : vector<1x1x8xf32> to vector<1x8xf32>
    %106 = vector.broadcast %105 : vector<1x8xf32> to vector<32x8xf32>
    %107 = arith.addf %103, %106 : vector<32x8xf32>
    %cst_52 = arith.constant 0.000000e+00 : f32
    %108 = vector.broadcast %cst_52 : f32 to vector<32x8xf32>
    %109 = arith.maximumf %107, %108 : vector<32x8xf32>
    %110 = arith.negf %109 : vector<32x8xf32>
    %111 = math.exp %110 : vector<32x8xf32>
    %cst_53 = arith.constant 1.000000e+00 : f32
    %112 = vector.broadcast %cst_53 : f32 to vector<32x8xf32>
    %113 = arith.addf %112, %111 : vector<32x8xf32>
    %114 = arith.divf %112, %113 : vector<32x8xf32>
    %115 = arith.mulf %67, %114 : vector<32x8xf32>
    %116 = vector.shape_cast %115 : vector<32x8xf32> to vector<2x16x8xf32>
    %cst_54 = arith.constant dense<0.000000e+00> : vector<2x8xf32>
    %117 = vector.multi_reduction <add>, %116, %cst_54 [1] : vector<2x16x8xf32> to vector<2x8xf32>
    %c1_55 = arith.constant 1 : index
    %118 = memref.load %arg8[%c1_55] : memref<4xf32, #tpu.memory_space<smem>>
    %119 = vector.broadcast %118 : f32 to vector<2x8xf32>
    %120 = arith.mulf %117, %119 : vector<2x8xf32>
    %121 = arith.addf %73, %120 : vector<2x8xf32>
    %c4_i32 = arith.constant 4 : i32
    %122 = tpu.dynamic_rotate %115 by %c4_i32 dim 0 : vector<32x8xf32>, i32 -> vector<32x8xf32>
    %c4_i32_56 = arith.constant 4 : i32
    %123 = vector.broadcast %c4_i32_56 : i32 to vector<32x1xi32>
    %124 = arith.cmpi sge, %18, %123 : vector<32x1xi32>
    %cst_57 = arith.constant 0.000000e+00 : f32
    %125 = vector.shape_cast %124 : vector<32x1xi1> to vector<32x1xi1>
    %126 = vector.broadcast %125 : vector<32x1xi1> to vector<32x8xi1>
    %127 = vector.broadcast %cst_57 : f32 to vector<32x8xf32>
    %128 = arith.select %126, %122, %127 : vector<32x8xi1>, vector<32x8xf32>
    %129 = tpu.concatenate %128, %115 in 1 : vector<32x8xf32>, vector<32x8xf32> -> vector<32x16xf32>
    %130 = arith.truncf %129 : vector<32x16xf32> to vector<32x16xbf16>
    %c4 = arith.constant 4 : index
    %c0_58 = arith.constant 0 : index
    %c0_59 = arith.constant 0 : index
    %131 = vector.load %arg4[%c4, %c0_58, %c0_59] : memref<16x16x8xbf16, #tpu.memory_space<vmem>>, vector<1x16x8xbf16>
    %132 = vector.shape_cast %131 : vector<1x16x8xbf16> to vector<16x8xbf16>
    %cst_60 = arith.constant dense<0.000000e+00> : vector<32x8xf32>
    %133 = tpu.matmul %130, %132, %cst_60 {dimension_numbers = #tpu.dot_dimension_numbers<[1], [0], [0], [1], [0, 0, 1, 1], [], []>} : vector<32x16xbf16>, vector<16x8xbf16>, vector<32x8xf32> -> vector<32x8xf32>
    %c4_61 = arith.constant 4 : index
    %c0_62 = arith.constant 0 : index
    %c0_63 = arith.constant 0 : index
    %134 = vector.load %arg5[%c4_61, %c0_62, %c0_63] : memref<16x1x8xf32, #tpu.memory_space<vmem>>, vector<1x1x8xf32>
    %135 = vector.shape_cast %134 : vector<1x1x8xf32> to vector<1x8xf32>
    %136 = vector.broadcast %135 : vector<1x8xf32> to vector<32x8xf32>
    %137 = arith.addf %133, %136 : vector<32x8xf32>
    %cst_64 = arith.constant 0.000000e+00 : f32
    %138 = vector.broadcast %cst_64 : f32 to vector<32x8xf32>
    %139 = arith.maximumf %137, %138 : vector<32x8xf32>
    %c4_i32_65 = arith.constant 4 : i32
    %140 = tpu.dynamic_rotate %139 by %c4_i32_65 dim 0 : vector<32x8xf32>, i32 -> vector<32x8xf32>
    %c4_i32_66 = arith.constant 4 : i32
    %141 = vector.broadcast %c4_i32_66 : i32 to vector<32x1xi32>
    %142 = arith.cmpi sge, %18, %141 : vector<32x1xi32>
    %cst_67 = arith.constant 0.000000e+00 : f32
    %143 = vector.shape_cast %142 : vector<32x1xi1> to vector<32x1xi1>
    %144 = vector.broadcast %143 : vector<32x1xi1> to vector<32x8xi1>
    %145 = vector.broadcast %cst_67 : f32 to vector<32x8xf32>
    %146 = arith.select %144, %140, %145 : vector<32x8xi1>, vector<32x8xf32>
    %147 = tpu.concatenate %146, %139 in 1 : vector<32x8xf32>, vector<32x8xf32> -> vector<32x16xf32>
    %148 = arith.truncf %147 : vector<32x16xf32> to vector<32x16xbf16>
    %c5 = arith.constant 5 : index
    %c0_68 = arith.constant 0 : index
    %c0_69 = arith.constant 0 : index
    %149 = vector.load %arg4[%c5, %c0_68, %c0_69] : memref<16x16x8xbf16, #tpu.memory_space<vmem>>, vector<1x16x8xbf16>
    %150 = vector.shape_cast %149 : vector<1x16x8xbf16> to vector<16x8xbf16>
    %cst_70 = arith.constant dense<0.000000e+00> : vector<32x8xf32>
    %151 = tpu.matmul %148, %150, %cst_70 {dimension_numbers = #tpu.dot_dimension_numbers<[1], [0], [0], [1], [0, 0, 1, 1], [], []>} : vector<32x16xbf16>, vector<16x8xbf16>, vector<32x8xf32> -> vector<32x8xf32>
    %c5_71 = arith.constant 5 : index
    %c0_72 = arith.constant 0 : index
    %c0_73 = arith.constant 0 : index
    %152 = vector.load %arg5[%c5_71, %c0_72, %c0_73] : memref<16x1x8xf32, #tpu.memory_space<vmem>>, vector<1x1x8xf32>
    %153 = vector.shape_cast %152 : vector<1x1x8xf32> to vector<1x8xf32>
    %154 = vector.broadcast %153 : vector<1x8xf32> to vector<32x8xf32>
    %155 = arith.addf %151, %154 : vector<32x8xf32>
    %cst_74 = arith.constant 0.000000e+00 : f32
    %156 = vector.broadcast %cst_74 : f32 to vector<32x8xf32>
    %157 = arith.maximumf %155, %156 : vector<32x8xf32>
    %158 = arith.negf %157 : vector<32x8xf32>
    %159 = math.exp %158 : vector<32x8xf32>
    %cst_75 = arith.constant 1.000000e+00 : f32
    %160 = vector.broadcast %cst_75 : f32 to vector<32x8xf32>
    %161 = arith.addf %160, %159 : vector<32x8xf32>
    %162 = arith.divf %160, %161 : vector<32x8xf32>
    %163 = arith.mulf %115, %162 : vector<32x8xf32>
    %164 = vector.shape_cast %163 : vector<32x8xf32> to vector<2x16x8xf32>
    %cst_76 = arith.constant dense<0.000000e+00> : vector<2x8xf32>
    %165 = vector.multi_reduction <add>, %164, %cst_76 [1] : vector<2x16x8xf32> to vector<2x8xf32>
    %c2_77 = arith.constant 2 : index
    %166 = memref.load %arg8[%c2_77] : memref<4xf32, #tpu.memory_space<smem>>
    %167 = vector.broadcast %166 : f32 to vector<2x8xf32>
    %168 = arith.mulf %165, %167 : vector<2x8xf32>
    %169 = arith.addf %121, %168 : vector<2x8xf32>
    %c8_i32 = arith.constant 8 : i32
    %170 = tpu.dynamic_rotate %163 by %c8_i32 dim 0 : vector<32x8xf32>, i32 -> vector<32x8xf32>
    %c8_i32_78 = arith.constant 8 : i32
    %171 = vector.broadcast %c8_i32_78 : i32 to vector<32x1xi32>
    %172 = arith.cmpi sge, %18, %171 : vector<32x1xi32>
    %cst_79 = arith.constant 0.000000e+00 : f32
    %173 = vector.shape_cast %172 : vector<32x1xi1> to vector<32x1xi1>
    %174 = vector.broadcast %173 : vector<32x1xi1> to vector<32x8xi1>
    %175 = vector.broadcast %cst_79 : f32 to vector<32x8xf32>
    %176 = arith.select %174, %170, %175 : vector<32x8xi1>, vector<32x8xf32>
    %177 = tpu.concatenate %176, %163 in 1 : vector<32x8xf32>, vector<32x8xf32> -> vector<32x16xf32>
    %178 = arith.truncf %177 : vector<32x16xf32> to vector<32x16xbf16>
    %c6 = arith.constant 6 : index
    %c0_80 = arith.constant 0 : index
    %c0_81 = arith.constant 0 : index
    %179 = vector.load %arg4[%c6, %c0_80, %c0_81] : memref<16x16x8xbf16, #tpu.memory_space<vmem>>, vector<1x16x8xbf16>
    %180 = vector.shape_cast %179 : vector<1x16x8xbf16> to vector<16x8xbf16>
    %cst_82 = arith.constant dense<0.000000e+00> : vector<32x8xf32>
    %181 = tpu.matmul %178, %180, %cst_82 {dimension_numbers = #tpu.dot_dimension_numbers<[1], [0], [0], [1], [0, 0, 1, 1], [], []>} : vector<32x16xbf16>, vector<16x8xbf16>, vector<32x8xf32> -> vector<32x8xf32>
    %c6_83 = arith.constant 6 : index
    %c0_84 = arith.constant 0 : index
    %c0_85 = arith.constant 0 : index
    %182 = vector.load %arg5[%c6_83, %c0_84, %c0_85] : memref<16x1x8xf32, #tpu.memory_space<vmem>>, vector<1x1x8xf32>
    %183 = vector.shape_cast %182 : vector<1x1x8xf32> to vector<1x8xf32>
    %184 = vector.broadcast %183 : vector<1x8xf32> to vector<32x8xf32>
    %185 = arith.addf %181, %184 : vector<32x8xf32>
    %cst_86 = arith.constant 0.000000e+00 : f32
    %186 = vector.broadcast %cst_86 : f32 to vector<32x8xf32>
    %187 = arith.maximumf %185, %186 : vector<32x8xf32>
    %c8_i32_87 = arith.constant 8 : i32
    %188 = tpu.dynamic_rotate %187 by %c8_i32_87 dim 0 : vector<32x8xf32>, i32 -> vector<32x8xf32>
    %c8_i32_88 = arith.constant 8 : i32
    %189 = vector.broadcast %c8_i32_88 : i32 to vector<32x1xi32>
    %190 = arith.cmpi sge, %18, %189 : vector<32x1xi32>
    %cst_89 = arith.constant 0.000000e+00 : f32
    %191 = vector.shape_cast %190 : vector<32x1xi1> to vector<32x1xi1>
    %192 = vector.broadcast %191 : vector<32x1xi1> to vector<32x8xi1>
    %193 = vector.broadcast %cst_89 : f32 to vector<32x8xf32>
    %194 = arith.select %192, %188, %193 : vector<32x8xi1>, vector<32x8xf32>
    %195 = tpu.concatenate %194, %187 in 1 : vector<32x8xf32>, vector<32x8xf32> -> vector<32x16xf32>
    %196 = arith.truncf %195 : vector<32x16xf32> to vector<32x16xbf16>
    %c7 = arith.constant 7 : index
    %c0_90 = arith.constant 0 : index
    %c0_91 = arith.constant 0 : index
    %197 = vector.load %arg4[%c7, %c0_90, %c0_91] : memref<16x16x8xbf16, #tpu.memory_space<vmem>>, vector<1x16x8xbf16>
    %198 = vector.shape_cast %197 : vector<1x16x8xbf16> to vector<16x8xbf16>
    %cst_92 = arith.constant dense<0.000000e+00> : vector<32x8xf32>
    %199 = tpu.matmul %196, %198, %cst_92 {dimension_numbers = #tpu.dot_dimension_numbers<[1], [0], [0], [1], [0, 0, 1, 1], [], []>} : vector<32x16xbf16>, vector<16x8xbf16>, vector<32x8xf32> -> vector<32x8xf32>
    %c7_93 = arith.constant 7 : index
    %c0_94 = arith.constant 0 : index
    %c0_95 = arith.constant 0 : index
    %200 = vector.load %arg5[%c7_93, %c0_94, %c0_95] : memref<16x1x8xf32, #tpu.memory_space<vmem>>, vector<1x1x8xf32>
    %201 = vector.shape_cast %200 : vector<1x1x8xf32> to vector<1x8xf32>
    %202 = vector.broadcast %201 : vector<1x8xf32> to vector<32x8xf32>
    %203 = arith.addf %199, %202 : vector<32x8xf32>
    %cst_96 = arith.constant 0.000000e+00 : f32
    %204 = vector.broadcast %cst_96 : f32 to vector<32x8xf32>
    %205 = arith.maximumf %203, %204 : vector<32x8xf32>
    %206 = arith.negf %205 : vector<32x8xf32>
    %207 = math.exp %206 : vector<32x8xf32>
    %cst_97 = arith.constant 1.000000e+00 : f32
    %208 = vector.broadcast %cst_97 : f32 to vector<32x8xf32>
    %209 = arith.addf %208, %207 : vector<32x8xf32>
    %210 = arith.divf %208, %209 : vector<32x8xf32>
    %211 = arith.mulf %163, %210 : vector<32x8xf32>
    %212 = vector.shape_cast %211 : vector<32x8xf32> to vector<2x16x8xf32>
    %cst_98 = arith.constant dense<0.000000e+00> : vector<2x8xf32>
    %213 = vector.multi_reduction <add>, %212, %cst_98 [1] : vector<2x16x8xf32> to vector<2x8xf32>
    %c3_99 = arith.constant 3 : index
    %214 = memref.load %arg8[%c3_99] : memref<4xf32, #tpu.memory_space<smem>>
    %215 = vector.broadcast %214 : f32 to vector<2x8xf32>
    %216 = arith.mulf %213, %215 : vector<2x8xf32>
    %217 = arith.addf %169, %216 : vector<2x8xf32>
    %c31_i32 = arith.constant 31 : i32
    %218 = tpu.dynamic_rotate %24 by %c31_i32 dim 0 : vector<32x8xf32>, i32 -> vector<32x8xf32>
    %c15_i32 = arith.constant 15 : i32
    %219 = vector.broadcast %c15_i32 : i32 to vector<32x1xi32>
    %220 = arith.cmpi slt, %18, %219 : vector<32x1xi32>
    %cst_100 = arith.constant 0.000000e+00 : f32
    %221 = vector.shape_cast %220 : vector<32x1xi1> to vector<32x1xi1>
    %222 = vector.broadcast %221 : vector<32x1xi1> to vector<32x8xi1>
    %223 = vector.broadcast %cst_100 : f32 to vector<32x8xf32>
    %224 = arith.select %222, %218, %223 : vector<32x8xi1>, vector<32x8xf32>
    %225 = tpu.concatenate %224, %24 in 1 : vector<32x8xf32>, vector<32x8xf32> -> vector<32x16xf32>
    %226 = arith.truncf %225 : vector<32x16xf32> to vector<32x16xbf16>
    %c8 = arith.constant 8 : index
    %c0_101 = arith.constant 0 : index
    %c0_102 = arith.constant 0 : index
    %227 = vector.load %arg4[%c8, %c0_101, %c0_102] : memref<16x16x8xbf16, #tpu.memory_space<vmem>>, vector<1x16x8xbf16>
    %228 = vector.shape_cast %227 : vector<1x16x8xbf16> to vector<16x8xbf16>
    %cst_103 = arith.constant dense<0.000000e+00> : vector<32x8xf32>
    %229 = tpu.matmul %226, %228, %cst_103 {dimension_numbers = #tpu.dot_dimension_numbers<[1], [0], [0], [1], [0, 0, 1, 1], [], []>} : vector<32x16xbf16>, vector<16x8xbf16>, vector<32x8xf32> -> vector<32x8xf32>
    %c8_104 = arith.constant 8 : index
    %c0_105 = arith.constant 0 : index
    %c0_106 = arith.constant 0 : index
    %230 = vector.load %arg5[%c8_104, %c0_105, %c0_106] : memref<16x1x8xf32, #tpu.memory_space<vmem>>, vector<1x1x8xf32>
    %231 = vector.shape_cast %230 : vector<1x1x8xf32> to vector<1x8xf32>
    %232 = vector.broadcast %231 : vector<1x8xf32> to vector<32x8xf32>
    %233 = arith.addf %229, %232 : vector<32x8xf32>
    %cst_107 = arith.constant 0.000000e+00 : f32
    %234 = vector.broadcast %cst_107 : f32 to vector<32x8xf32>
    %235 = arith.maximumf %233, %234 : vector<32x8xf32>
    %c31_i32_108 = arith.constant 31 : i32
    %236 = tpu.dynamic_rotate %235 by %c31_i32_108 dim 0 : vector<32x8xf32>, i32 -> vector<32x8xf32>
    %c15_i32_109 = arith.constant 15 : i32
    %237 = vector.broadcast %c15_i32_109 : i32 to vector<32x1xi32>
    %238 = arith.cmpi slt, %18, %237 : vector<32x1xi32>
    %cst_110 = arith.constant 0.000000e+00 : f32
    %239 = vector.shape_cast %238 : vector<32x1xi1> to vector<32x1xi1>
    %240 = vector.broadcast %239 : vector<32x1xi1> to vector<32x8xi1>
    %241 = vector.broadcast %cst_110 : f32 to vector<32x8xf32>
    %242 = arith.select %240, %236, %241 : vector<32x8xi1>, vector<32x8xf32>
    %243 = tpu.concatenate %242, %235 in 1 : vector<32x8xf32>, vector<32x8xf32> -> vector<32x16xf32>
    %244 = arith.truncf %243 : vector<32x16xf32> to vector<32x16xbf16>
    %c9 = arith.constant 9 : index
    %c0_111 = arith.constant 0 : index
    %c0_112 = arith.constant 0 : index
    %245 = vector.load %arg4[%c9, %c0_111, %c0_112] : memref<16x16x8xbf16, #tpu.memory_space<vmem>>, vector<1x16x8xbf16>
    %246 = vector.shape_cast %245 : vector<1x16x8xbf16> to vector<16x8xbf16>
    %cst_113 = arith.constant dense<0.000000e+00> : vector<32x8xf32>
    %247 = tpu.matmul %244, %246, %cst_113 {dimension_numbers = #tpu.dot_dimension_numbers<[1], [0], [0], [1], [0, 0, 1, 1], [], []>} : vector<32x16xbf16>, vector<16x8xbf16>, vector<32x8xf32> -> vector<32x8xf32>
    %c9_114 = arith.constant 9 : index
    %c0_115 = arith.constant 0 : index
    %c0_116 = arith.constant 0 : index
    %248 = vector.load %arg5[%c9_114, %c0_115, %c0_116] : memref<16x1x8xf32, #tpu.memory_space<vmem>>, vector<1x1x8xf32>
    %249 = vector.shape_cast %248 : vector<1x1x8xf32> to vector<1x8xf32>
    %250 = vector.broadcast %249 : vector<1x8xf32> to vector<32x8xf32>
    %251 = arith.addf %247, %250 : vector<32x8xf32>
    %cst_117 = arith.constant 0.000000e+00 : f32
    %252 = vector.broadcast %cst_117 : f32 to vector<32x8xf32>
    %253 = arith.maximumf %251, %252 : vector<32x8xf32>
    %254 = arith.negf %253 : vector<32x8xf32>
    %255 = math.exp %254 : vector<32x8xf32>
    %cst_118 = arith.constant 1.000000e+00 : f32
    %256 = vector.broadcast %cst_118 : f32 to vector<32x8xf32>
    %257 = arith.addf %256, %255 : vector<32x8xf32>
    %258 = arith.divf %256, %257 : vector<32x8xf32>
    %259 = arith.mulf %24, %258 : vector<32x8xf32>
    %260 = vector.shape_cast %259 : vector<32x8xf32> to vector<2x16x8xf32>
    %cst_119 = arith.constant dense<0.000000e+00> : vector<2x8xf32>
    %261 = vector.multi_reduction <add>, %260, %cst_119 [1] : vector<2x16x8xf32> to vector<2x8xf32>
    %c0_120 = arith.constant 0 : index
    %262 = memref.load %arg8[%c0_120] : memref<4xf32, #tpu.memory_space<smem>>
    %263 = vector.broadcast %262 : f32 to vector<2x8xf32>
    %264 = arith.mulf %261, %263 : vector<2x8xf32>
    %265 = arith.addf %217, %264 : vector<2x8xf32>
    %c30_i32 = arith.constant 30 : i32
    %266 = tpu.dynamic_rotate %259 by %c30_i32 dim 0 : vector<32x8xf32>, i32 -> vector<32x8xf32>
    %c14_i32 = arith.constant 14 : i32
    %267 = vector.broadcast %c14_i32 : i32 to vector<32x1xi32>
    %268 = arith.cmpi slt, %18, %267 : vector<32x1xi32>
    %cst_121 = arith.constant 0.000000e+00 : f32
    %269 = vector.shape_cast %268 : vector<32x1xi1> to vector<32x1xi1>
    %270 = vector.broadcast %269 : vector<32x1xi1> to vector<32x8xi1>
    %271 = vector.broadcast %cst_121 : f32 to vector<32x8xf32>
    %272 = arith.select %270, %266, %271 : vector<32x8xi1>, vector<32x8xf32>
    %273 = tpu.concatenate %272, %259 in 1 : vector<32x8xf32>, vector<32x8xf32> -> vector<32x16xf32>
    %274 = arith.truncf %273 : vector<32x16xf32> to vector<32x16xbf16>
    %c10 = arith.constant 10 : index
    %c0_122 = arith.constant 0 : index
    %c0_123 = arith.constant 0 : index
    %275 = vector.load %arg4[%c10, %c0_122, %c0_123] : memref<16x16x8xbf16, #tpu.memory_space<vmem>>, vector<1x16x8xbf16>
    %276 = vector.shape_cast %275 : vector<1x16x8xbf16> to vector<16x8xbf16>
    %cst_124 = arith.constant dense<0.000000e+00> : vector<32x8xf32>
    %277 = tpu.matmul %274, %276, %cst_124 {dimension_numbers = #tpu.dot_dimension_numbers<[1], [0], [0], [1], [0, 0, 1, 1], [], []>} : vector<32x16xbf16>, vector<16x8xbf16>, vector<32x8xf32> -> vector<32x8xf32>
    %c10_125 = arith.constant 10 : index
    %c0_126 = arith.constant 0 : index
    %c0_127 = arith.constant 0 : index
    %278 = vector.load %arg5[%c10_125, %c0_126, %c0_127] : memref<16x1x8xf32, #tpu.memory_space<vmem>>, vector<1x1x8xf32>
    %279 = vector.shape_cast %278 : vector<1x1x8xf32> to vector<1x8xf32>
    %280 = vector.broadcast %279 : vector<1x8xf32> to vector<32x8xf32>
    %281 = arith.addf %277, %280 : vector<32x8xf32>
    %cst_128 = arith.constant 0.000000e+00 : f32
    %282 = vector.broadcast %cst_128 : f32 to vector<32x8xf32>
    %283 = arith.maximumf %281, %282 : vector<32x8xf32>
    %c30_i32_129 = arith.constant 30 : i32
    %284 = tpu.dynamic_rotate %283 by %c30_i32_129 dim 0 : vector<32x8xf32>, i32 -> vector<32x8xf32>
    %c14_i32_130 = arith.constant 14 : i32
    %285 = vector.broadcast %c14_i32_130 : i32 to vector<32x1xi32>
    %286 = arith.cmpi slt, %18, %285 : vector<32x1xi32>
    %cst_131 = arith.constant 0.000000e+00 : f32
    %287 = vector.shape_cast %286 : vector<32x1xi1> to vector<32x1xi1>
    %288 = vector.broadcast %287 : vector<32x1xi1> to vector<32x8xi1>
    %289 = vector.broadcast %cst_131 : f32 to vector<32x8xf32>
    %290 = arith.select %288, %284, %289 : vector<32x8xi1>, vector<32x8xf32>
    %291 = tpu.concatenate %290, %283 in 1 : vector<32x8xf32>, vector<32x8xf32> -> vector<32x16xf32>
    %292 = arith.truncf %291 : vector<32x16xf32> to vector<32x16xbf16>
    %c11 = arith.constant 11 : index
    %c0_132 = arith.constant 0 : index
    %c0_133 = arith.constant 0 : index
    %293 = vector.load %arg4[%c11, %c0_132, %c0_133] : memref<16x16x8xbf16, #tpu.memory_space<vmem>>, vector<1x16x8xbf16>
    %294 = vector.shape_cast %293 : vector<1x16x8xbf16> to vector<16x8xbf16>
    %cst_134 = arith.constant dense<0.000000e+00> : vector<32x8xf32>
    %295 = tpu.matmul %292, %294, %cst_134 {dimension_numbers = #tpu.dot_dimension_numbers<[1], [0], [0], [1], [0, 0, 1, 1], [], []>} : vector<32x16xbf16>, vector<16x8xbf16>, vector<32x8xf32> -> vector<32x8xf32>
    %c11_135 = arith.constant 11 : index
    %c0_136 = arith.constant 0 : index
    %c0_137 = arith.constant 0 : index
    %296 = vector.load %arg5[%c11_135, %c0_136, %c0_137] : memref<16x1x8xf32, #tpu.memory_space<vmem>>, vector<1x1x8xf32>
    %297 = vector.shape_cast %296 : vector<1x1x8xf32> to vector<1x8xf32>
    %298 = vector.broadcast %297 : vector<1x8xf32> to vector<32x8xf32>
    %299 = arith.addf %295, %298 : vector<32x8xf32>
    %cst_138 = arith.constant 0.000000e+00 : f32
    %300 = vector.broadcast %cst_138 : f32 to vector<32x8xf32>
    %301 = arith.maximumf %299, %300 : vector<32x8xf32>
    %302 = arith.negf %301 : vector<32x8xf32>
    %303 = math.exp %302 : vector<32x8xf32>
    %cst_139 = arith.constant 1.000000e+00 : f32
    %304 = vector.broadcast %cst_139 : f32 to vector<32x8xf32>
    %305 = arith.addf %304, %303 : vector<32x8xf32>
    %306 = arith.divf %304, %305 : vector<32x8xf32>
    %307 = arith.mulf %259, %306 : vector<32x8xf32>
    %308 = vector.shape_cast %307 : vector<32x8xf32> to vector<2x16x8xf32>
    %cst_140 = arith.constant dense<0.000000e+00> : vector<2x8xf32>
    %309 = vector.multi_reduction <add>, %308, %cst_140 [1] : vector<2x16x8xf32> to vector<2x8xf32>
    %c1_141 = arith.constant 1 : index
    %310 = memref.load %arg8[%c1_141] : memref<4xf32, #tpu.memory_space<smem>>
    %311 = vector.broadcast %310 : f32 to vector<2x8xf32>
    %312 = arith.mulf %309, %311 : vector<2x8xf32>
    %313 = arith.addf %265, %312 : vector<2x8xf32>
    %c28_i32 = arith.constant 28 : i32
    %314 = tpu.dynamic_rotate %307 by %c28_i32 dim 0 : vector<32x8xf32>, i32 -> vector<32x8xf32>
    %c12_i32 = arith.constant 12 : i32
    %315 = vector.broadcast %c12_i32 : i32 to vector<32x1xi32>
    %316 = arith.cmpi slt, %18, %315 : vector<32x1xi32>
    %cst_142 = arith.constant 0.000000e+00 : f32
    %317 = vector.shape_cast %316 : vector<32x1xi1> to vector<32x1xi1>
    %318 = vector.broadcast %317 : vector<32x1xi1> to vector<32x8xi1>
    %319 = vector.broadcast %cst_142 : f32 to vector<32x8xf32>
    %320 = arith.select %318, %314, %319 : vector<32x8xi1>, vector<32x8xf32>
    %321 = tpu.concatenate %320, %307 in 1 : vector<32x8xf32>, vector<32x8xf32> -> vector<32x16xf32>
    %322 = arith.truncf %321 : vector<32x16xf32> to vector<32x16xbf16>
    %c12 = arith.constant 12 : index
    %c0_143 = arith.constant 0 : index
    %c0_144 = arith.constant 0 : index
    %323 = vector.load %arg4[%c12, %c0_143, %c0_144] : memref<16x16x8xbf16, #tpu.memory_space<vmem>>, vector<1x16x8xbf16>
    %324 = vector.shape_cast %323 : vector<1x16x8xbf16> to vector<16x8xbf16>
    %cst_145 = arith.constant dense<0.000000e+00> : vector<32x8xf32>
    %325 = tpu.matmul %322, %324, %cst_145 {dimension_numbers = #tpu.dot_dimension_numbers<[1], [0], [0], [1], [0, 0, 1, 1], [], []>} : vector<32x16xbf16>, vector<16x8xbf16>, vector<32x8xf32> -> vector<32x8xf32>
    %c12_146 = arith.constant 12 : index
    %c0_147 = arith.constant 0 : index
    %c0_148 = arith.constant 0 : index
    %326 = vector.load %arg5[%c12_146, %c0_147, %c0_148] : memref<16x1x8xf32, #tpu.memory_space<vmem>>, vector<1x1x8xf32>
    %327 = vector.shape_cast %326 : vector<1x1x8xf32> to vector<1x8xf32>
    %328 = vector.broadcast %327 : vector<1x8xf32> to vector<32x8xf32>
    %329 = arith.addf %325, %328 : vector<32x8xf32>
    %cst_149 = arith.constant 0.000000e+00 : f32
    %330 = vector.broadcast %cst_149 : f32 to vector<32x8xf32>
    %331 = arith.maximumf %329, %330 : vector<32x8xf32>
    %c28_i32_150 = arith.constant 28 : i32
    %332 = tpu.dynamic_rotate %331 by %c28_i32_150 dim 0 : vector<32x8xf32>, i32 -> vector<32x8xf32>
    %c12_i32_151 = arith.constant 12 : i32
    %333 = vector.broadcast %c12_i32_151 : i32 to vector<32x1xi32>
    %334 = arith.cmpi slt, %18, %333 : vector<32x1xi32>
    %cst_152 = arith.constant 0.000000e+00 : f32
    %335 = vector.shape_cast %334 : vector<32x1xi1> to vector<32x1xi1>
    %336 = vector.broadcast %335 : vector<32x1xi1> to vector<32x8xi1>
    %337 = vector.broadcast %cst_152 : f32 to vector<32x8xf32>
    %338 = arith.select %336, %332, %337 : vector<32x8xi1>, vector<32x8xf32>
    %339 = tpu.concatenate %338, %331 in 1 : vector<32x8xf32>, vector<32x8xf32> -> vector<32x16xf32>
    %340 = arith.truncf %339 : vector<32x16xf32> to vector<32x16xbf16>
    %c13 = arith.constant 13 : index
    %c0_153 = arith.constant 0 : index
    %c0_154 = arith.constant 0 : index
    %341 = vector.load %arg4[%c13, %c0_153, %c0_154] : memref<16x16x8xbf16, #tpu.memory_space<vmem>>, vector<1x16x8xbf16>
    %342 = vector.shape_cast %341 : vector<1x16x8xbf16> to vector<16x8xbf16>
    %cst_155 = arith.constant dense<0.000000e+00> : vector<32x8xf32>
    %343 = tpu.matmul %340, %342, %cst_155 {dimension_numbers = #tpu.dot_dimension_numbers<[1], [0], [0], [1], [0, 0, 1, 1], [], []>} : vector<32x16xbf16>, vector<16x8xbf16>, vector<32x8xf32> -> vector<32x8xf32>
    %c13_156 = arith.constant 13 : index
    %c0_157 = arith.constant 0 : index
    %c0_158 = arith.constant 0 : index
    %344 = vector.load %arg5[%c13_156, %c0_157, %c0_158] : memref<16x1x8xf32, #tpu.memory_space<vmem>>, vector<1x1x8xf32>
    %345 = vector.shape_cast %344 : vector<1x1x8xf32> to vector<1x8xf32>
    %346 = vector.broadcast %345 : vector<1x8xf32> to vector<32x8xf32>
    %347 = arith.addf %343, %346 : vector<32x8xf32>
    %cst_159 = arith.constant 0.000000e+00 : f32
    %348 = vector.broadcast %cst_159 : f32 to vector<32x8xf32>
    %349 = arith.maximumf %347, %348 : vector<32x8xf32>
    %350 = arith.negf %349 : vector<32x8xf32>
    %351 = math.exp %350 : vector<32x8xf32>
    %cst_160 = arith.constant 1.000000e+00 : f32
    %352 = vector.broadcast %cst_160 : f32 to vector<32x8xf32>
    %353 = arith.addf %352, %351 : vector<32x8xf32>
    %354 = arith.divf %352, %353 : vector<32x8xf32>
    %355 = arith.mulf %307, %354 : vector<32x8xf32>
    %356 = vector.shape_cast %355 : vector<32x8xf32> to vector<2x16x8xf32>
    %cst_161 = arith.constant dense<0.000000e+00> : vector<2x8xf32>
    %357 = vector.multi_reduction <add>, %356, %cst_161 [1] : vector<2x16x8xf32> to vector<2x8xf32>
    %c2_162 = arith.constant 2 : index
    %358 = memref.load %arg8[%c2_162] : memref<4xf32, #tpu.memory_space<smem>>
    %359 = vector.broadcast %358 : f32 to vector<2x8xf32>
    %360 = arith.mulf %357, %359 : vector<2x8xf32>
    %361 = arith.addf %313, %360 : vector<2x8xf32>
    %c24_i32 = arith.constant 24 : i32
    %362 = tpu.dynamic_rotate %355 by %c24_i32 dim 0 : vector<32x8xf32>, i32 -> vector<32x8xf32>
    %c8_i32_163 = arith.constant 8 : i32
    %363 = vector.broadcast %c8_i32_163 : i32 to vector<32x1xi32>
    %364 = arith.cmpi slt, %18, %363 : vector<32x1xi32>
    %cst_164 = arith.constant 0.000000e+00 : f32
    %365 = vector.shape_cast %364 : vector<32x1xi1> to vector<32x1xi1>
    %366 = vector.broadcast %365 : vector<32x1xi1> to vector<32x8xi1>
    %367 = vector.broadcast %cst_164 : f32 to vector<32x8xf32>
    %368 = arith.select %366, %362, %367 : vector<32x8xi1>, vector<32x8xf32>
    %369 = tpu.concatenate %368, %355 in 1 : vector<32x8xf32>, vector<32x8xf32> -> vector<32x16xf32>
    %370 = arith.truncf %369 : vector<32x16xf32> to vector<32x16xbf16>
    %c14 = arith.constant 14 : index
    %c0_165 = arith.constant 0 : index
    %c0_166 = arith.constant 0 : index
    %371 = vector.load %arg4[%c14, %c0_165, %c0_166] : memref<16x16x8xbf16, #tpu.memory_space<vmem>>, vector<1x16x8xbf16>
    %372 = vector.shape_cast %371 : vector<1x16x8xbf16> to vector<16x8xbf16>
    %cst_167 = arith.constant dense<0.000000e+00> : vector<32x8xf32>
    %373 = tpu.matmul %370, %372, %cst_167 {dimension_numbers = #tpu.dot_dimension_numbers<[1], [0], [0], [1], [0, 0, 1, 1], [], []>} : vector<32x16xbf16>, vector<16x8xbf16>, vector<32x8xf32> -> vector<32x8xf32>
    %c14_168 = arith.constant 14 : index
    %c0_169 = arith.constant 0 : index
    %c0_170 = arith.constant 0 : index
    %374 = vector.load %arg5[%c14_168, %c0_169, %c0_170] : memref<16x1x8xf32, #tpu.memory_space<vmem>>, vector<1x1x8xf32>
    %375 = vector.shape_cast %374 : vector<1x1x8xf32> to vector<1x8xf32>
    %376 = vector.broadcast %375 : vector<1x8xf32> to vector<32x8xf32>
    %377 = arith.addf %373, %376 : vector<32x8xf32>
    %cst_171 = arith.constant 0.000000e+00 : f32
    %378 = vector.broadcast %cst_171 : f32 to vector<32x8xf32>
    %379 = arith.maximumf %377, %378 : vector<32x8xf32>
    %c24_i32_172 = arith.constant 24 : i32
    %380 = tpu.dynamic_rotate %379 by %c24_i32_172 dim 0 : vector<32x8xf32>, i32 -> vector<32x8xf32>
    %c8_i32_173 = arith.constant 8 : i32
    %381 = vector.broadcast %c8_i32_173 : i32 to vector<32x1xi32>
    %382 = arith.cmpi slt, %18, %381 : vector<32x1xi32>
    %cst_174 = arith.constant 0.000000e+00 : f32
    %383 = vector.shape_cast %382 : vector<32x1xi1> to vector<32x1xi1>
    %384 = vector.broadcast %383 : vector<32x1xi1> to vector<32x8xi1>
    %385 = vector.broadcast %cst_174 : f32 to vector<32x8xf32>
    %386 = arith.select %384, %380, %385 : vector<32x8xi1>, vector<32x8xf32>
    %387 = tpu.concatenate %386, %379 in 1 : vector<32x8xf32>, vector<32x8xf32> -> vector<32x16xf32>
    %388 = arith.truncf %387 : vector<32x16xf32> to vector<32x16xbf16>
    %c15 = arith.constant 15 : index
    %c0_175 = arith.constant 0 : index
    %c0_176 = arith.constant 0 : index
    %389 = vector.load %arg4[%c15, %c0_175, %c0_176] : memref<16x16x8xbf16, #tpu.memory_space<vmem>>, vector<1x16x8xbf16>
    %390 = vector.shape_cast %389 : vector<1x16x8xbf16> to vector<16x8xbf16>
    %cst_177 = arith.constant dense<0.000000e+00> : vector<32x8xf32>
    %391 = tpu.matmul %388, %390, %cst_177 {dimension_numbers = #tpu.dot_dimension_numbers<[1], [0], [0], [1], [0, 0, 1, 1], [], []>} : vector<32x16xbf16>, vector<16x8xbf16>, vector<32x8xf32> -> vector<32x8xf32>
    %c15_178 = arith.constant 15 : index
    %c0_179 = arith.constant 0 : index
    %c0_180 = arith.constant 0 : index
    %392 = vector.load %arg5[%c15_178, %c0_179, %c0_180] : memref<16x1x8xf32, #tpu.memory_space<vmem>>, vector<1x1x8xf32>
    %393 = vector.shape_cast %392 : vector<1x1x8xf32> to vector<1x8xf32>
    %394 = vector.broadcast %393 : vector<1x8xf32> to vector<32x8xf32>
    %395 = arith.addf %391, %394 : vector<32x8xf32>
    %cst_181 = arith.constant 0.000000e+00 : f32
    %396 = vector.broadcast %cst_181 : f32 to vector<32x8xf32>
    %397 = arith.maximumf %395, %396 : vector<32x8xf32>
    %398 = arith.negf %397 : vector<32x8xf32>
    %399 = math.exp %398 : vector<32x8xf32>
    %cst_182 = arith.constant 1.000000e+00 : f32
    %400 = vector.broadcast %cst_182 : f32 to vector<32x8xf32>
    %401 = arith.addf %400, %399 : vector<32x8xf32>
    %402 = arith.divf %400, %401 : vector<32x8xf32>
    %403 = arith.mulf %355, %402 : vector<32x8xf32>
    %404 = vector.shape_cast %403 : vector<32x8xf32> to vector<2x16x8xf32>
    %cst_183 = arith.constant dense<0.000000e+00> : vector<2x8xf32>
    %405 = vector.multi_reduction <add>, %404, %cst_183 [1] : vector<2x16x8xf32> to vector<2x8xf32>
    %c3_184 = arith.constant 3 : index
    %406 = memref.load %arg8[%c3_184] : memref<4xf32, #tpu.memory_space<smem>>
    %407 = vector.broadcast %406 : f32 to vector<2x8xf32>
    %408 = arith.mulf %405, %407 : vector<2x8xf32>
    %409 = arith.addf %361, %408 : vector<2x8xf32>
    %c0_185 = arith.constant 0 : index
    %c0_186 = arith.constant 0 : index
    %410 = vector.load %arg6[%c0_185, %c0_186] : memref<8x8xf32, #tpu.memory_space<vmem>>, vector<8x8xf32>
    %cst_187 = arith.constant dense<0.000000e+00> : vector<2x8xf32>
    %411 = tpu.matmul %409, %410, %cst_187 {dimension_numbers = #tpu.dot_dimension_numbers<[1], [0], [0], [1], [0, 0, 1, 1], [], []>} : vector<2x8xf32>, vector<8x8xf32>, vector<2x8xf32> -> vector<2x8xf32>
    %c0_188 = arith.constant 0 : index
    %c0_189 = arith.constant 0 : index
    %412 = vector.load %arg7[%c0_188, %c0_189] : memref<1x8xf32, #tpu.memory_space<vmem>>, vector<1x8xf32>
    %413 = vector.broadcast %412 : vector<1x8xf32> to vector<2x8xf32>
    %414 = arith.addf %411, %413 : vector<2x8xf32>
    %cst_190 = arith.constant dense<0xFF800000> : vector<2xf32>
    %415 = vector.multi_reduction <maximumf>, %414, %cst_190 [1] : vector<2x8xf32> to vector<2xf32>
    %416 = vector.shape_cast %415 : vector<2xf32> to vector<2x1xf32>
    %417 = vector.broadcast %416 : vector<2x1xf32> to vector<2x8xf32>
    %418 = arith.subf %414, %417 : vector<2x8xf32>
    %419 = math.exp %418 : vector<2x8xf32>
    %cst_191 = arith.constant dense<0.000000e+00> : vector<2xf32>
    %420 = vector.multi_reduction <add>, %419, %cst_191 [1] : vector<2x8xf32> to vector<2xf32>
    %421 = vector.shape_cast %420 : vector<2xf32> to vector<2x1xf32>
    %422 = math.log %421 : vector<2x1xf32>
    %423 = arith.addf %416, %422 : vector<2x1xf32>
    %424 = vector.broadcast %423 : vector<2x1xf32> to vector<2x8xf32>
    %425 = arith.subf %414, %424 : vector<2x8xf32>
    %c0_192 = arith.constant 0 : index
    %c0_193 = arith.constant 0 : index
    %c0_194 = arith.constant 0 : index
    %426 = vector.load %arg9[%c0_192, %c0_193, %c0_194] : memref<1x2x8xf32, #tpu.memory_space<vmem>>, vector<1x2x8xf32>
    %427 = vector.shape_cast %426 : vector<1x2x8xf32> to vector<2x8xf32>
    %428 = vector.shape_cast %425 : vector<2x8xf32> to vector<1x2x8xf32>
    tpu.vector_store %arg9[%c0_192, %c0_193, %c0_194], %428 {strides = array<i32>} : memref<1x2x8xf32, #tpu.memory_space<vmem>>, vector<1x2x8xf32>,
    return
  }
  func.func @transform_0(%arg0: i32) -> (i32, i32, i32) {
    %c0_i32 = arith.constant 0 : i32
    %c0_i32_0 = arith.constant 0 : i32
    %c0_i32_1 = arith.constant 0 : i32
    return %arg0, %c0_i32, %c0_i32_0 : i32, i32, i32
  }
  func.func @transform_1(%arg0: i32) -> (i32, i32) {
    %c0_i32 = arith.constant 0 : i32
    %c0_i32_0 = arith.constant 0 : i32
    %c0_i32_1 = arith.constant 0 : i32
    return %c0_i32, %c0_i32_0 : i32, i32
  }
  func.func @transform_2(%arg0: i32) -> (i32, i32) {
    %c0_i32 = arith.constant 0 : i32
    %c0_i32_0 = arith.constant 0 : i32
    %c0_i32_1 = arith.constant 0 : i32
    return %c0_i32, %c0_i32_0 : i32, i32
  }
  func.func @transform_3(%arg0: i32) -> (i32, i32, i32) {
    %c0_i32 = arith.constant 0 : i32
    %c0_i32_0 = arith.constant 0 : i32
    %c0_i32_1 = arith.constant 0 : i32
    %c0_i32_2 = arith.constant 0 : i32
    return %c0_i32, %c0_i32_0, %c0_i32_1 : i32, i32, i32
  }
  func.func @transform_4(%arg0: i32) -> (i32, i32, i32) {
    %c0_i32 = arith.constant 0 : i32
    %c0_i32_0 = arith.constant 0 : i32
    %c0_i32_1 = arith.constant 0 : i32
    %c0_i32_2 = arith.constant 0 : i32
    return %c0_i32, %c0_i32_0, %c0_i32_1 : i32, i32, i32
  }
  func.func @transform_5(%arg0: i32) -> (i32, i32) {
    %c0_i32 = arith.constant 0 : i32
    %c0_i32_0 = arith.constant 0 : i32
    %c0_i32_1 = arith.constant 0 : i32
    return %c0_i32, %c0_i32_0 : i32, i32
  }
  func.func @transform_6(%arg0: i32) -> (i32, i32) {
    %c0_i32 = arith.constant 0 : i32
    %c0_i32_0 = arith.constant 0 : i32
    %c0_i32_1 = arith.constant 0 : i32
    return %c0_i32, %c0_i32_0 : i32, i32
  }
  func.func @transform_7(%arg0: i32) -> i32 {
    %c0_i32 = arith.constant 0 : i32
    %c0_i32_0 = arith.constant 0 : i32
    return %c0_i32 : i32
  }
  func.func @transform_8(%arg0: i32) -> (i32, i32, i32) {
    %c0_i32 = arith.constant 0 : i32
    %c0_i32_0 = arith.constant 0 : i32
    %c0_i32_1 = arith.constant 0 : i32
    return %arg0, %c0_i32, %c0_i32_0 : i32, i32, i32
  }
}

</mosaic_0001>

<bundles_post_ra>
// kernel: tpu_custom_call.1
= control target key start
LH: loop header
LB: loop body
LE: loop exit
PB: predicated region body
PF: predicated region fallthrough
CT: control target
= control target key end

     0   :  { %13 = vsyncpa [#allocation4], 0  ;;  %s3914_s0 = inlined_call_operand.vmem [shape: f32[2,16,8], index: 0, kind: input, shape index: {}]   ;;  %s3915_s1 = inlined_call_operand.vmem [shape: bf16[8,8], index: 1, kind: input, shape index: {}]   ;;  %s3916_s2 = inlined_call_operand.vmem [shape: f32[1,8], index: 2, kind: input, shape index: {}]   ;;  %s3917_s3 = inlined_call_operand.vmem [shape: bf16[16,16,8], index: 3, kind: input, shape index: {}]   ;;  %s3918_s4 = inlined_call_operand.vmem [shape: f32[16,1,8], index: 4, kind: input, shape index: {}]   ;;  %s3919_s5 = inlined_call_operand.vmem [shape: f32[8,8], index: 5, kind: input, shape index: {}]   ;;  %s3920_s6 = inlined_call_operand.vmem [shape: f32[1,8], index: 6, kind: input, shape index: {}]   ;;  %s3921_s7 = inlined_call_operand.vmem [shape: f32[4], index: 7, kind: input, shape index: {}]   ;;  %s3922_s8 = inlined_call_operand.hbm [shape: f32[1,2,8], index: 8, kind: output, shape index: {}]  }
   0x1   :  { %14 = vsyncpa [#allocation3], 0  ;;  %s35_s29 = sshll.u32 %s3921_s7, 4  ;;  %s36_s29 = int_to_ptr.vmem [resolvable:$true] %s35_s29 }
   0x2   :  { %s3118_s30 = scalar_lea.vmem %s36_s29, 16  ;;  %p3123_p1 = scmp.lt.s32.totalorder %s36_s29, %s36_s29 }
   0x3   :  { %p3119_p0 = scmp.ne.s32.totalorder %s36_s29, %s3118_s30  ;;  %p3124_p2 = scmp.lt.s32.totalorder %s3118_s30, %s3118_s30 }
   0x5   :  { %p3125_p3 = por %p3124_p2, %p3123_p1 }
   0x7   :  { %p3126_p4 = pnand %p3125_p3, %p3119_p0 }
   0x9   :  { %3129 = shalt.err (!%p3126_p4)
}
   0xa   :  { %s3156_s9 = smov [#allocation2]  }
   0xb   :  { %38 = dma.vmem_to_smem %s36_s29, 16, %s3156_s9, [#allocation4]  }
   0xc   :  { %3152 = dma.done.wait [#allocation4], 16  }
   0xd   :  { %3153 = vsyncadd [#allocation4], 4294967280 }
   0xe   :  { %42 = sfence }
   0xf   :  { %v103_v0 = vld [vmem:[%s3915_s1] sm:$0xf]  ;;  %vm118_vm0 = vcmask 1043456   ;;  %v45_v2 = vld [vmem:[%s3914_s0 + $0x8] sm:$0xff]  ;;  %vm111_vm1 = vcmask 64512   ;;  %v46_v5 = vld [vmem:[%s3914_s0 + $0x10] sm:$0xff]  ;;  %v48_v20 = vlaneseq }
  0x10   :  { %v44_v1 = vld [vmem:[%s3914_s0] sm:$0xff]  ;;  %2814 = vmatprep.subr.msk.bf16.mxu0 %vm118_vm0, %v103_v0  ;;  %v120_v3 = vsel %vm118_vm0, %v103_v0, 0  ;;  %v47_v6 = vld [vmem:[%s3914_s0 + $0x18] sm:$0xff]  ;;  %s3157_s0 = smov 8   ;;  %vm233_vm8 = vcmask 130048   ;;  %s3859_s10 = sld [smem:[#allocation2 + $0x1]] }
  0x11   :  { %v101_v4 = vpack.c.bf16 %v45_v2, %v44_v1  ;;  %2708 = vmatpush3.bf16.msra.mxu0 %v120_v3  ;;  %v102_v7 = vpack.c.bf16 %v47_v6, %v46_v5  ;;  %v2970_v8 = vld [vmem:[%s3917_s3] sm:$0xff]   ;;  %v3246_v21 = vshrl.u32 %v48_v20, 7  ;;  %v2971_v5 = vld [vmem:[%s3917_s3 + $0x8] sm:$0xff]   ;;  %s3867_s11 = sld [smem:[#allocation2 + $0x2]]  ;;  %s3877_s12 = sld [smem:[#allocation2 + $0x3]] }
  0x12   :  { %2713 = vmatprep.subr.bf16.mxu1 %v2970_v8  ;;  %v2505_v10 = vld [vmem:[%s3916_s2] ss:$0 sm:$0xff]  ;;  %2719 = vmatprep.subr.bf16.mxu0 %v2971_v5 }
  0x13   :  { %2709 = vmatprep.mubr.msk.bf16.mxu0 %vm111_vm1, %v101_v4  ;;  %2714 = vmatpush3.bf16.msra.mxu1 %v2970_v8  ;;  %v50_v22 = vadd.s32 8, %v3246_v21  ;;  %v51_v23 = vadd.s32 16, %v3246_v21  ;;  %v52_v24 = vadd.s32 24, %v3246_v21  ;;  %v3252_v25 = vand.u32 15, %v3246_v21  ;;  %v2508_v3 = vld [vmem:[%s3918_s4] ss:$0 sm:$0xff] }
  0x14   :  { %2710 = vmatmul.mubr.msk.bf16.vlgmr.msra.gmra.mrb[0].mxu0 %vm111_vm1, %v102_v7  ;;  %vm1297_vm2 = vcmp.lt.s32.totalorder %v3246_v21, 7  ;;  %vm175_vm3 = vcmp.lt.s32.totalorder %v3246_v21, 1  ;;  %vm459_vm9 = vcmp.lt.s32.totalorder %v3246_v21, 2  ;;  %vm744_vm12 = vcmp.lt.s32.totalorder %v3246_v21, 4 }
  0x15   :  { %v3254_v26 = vand.u32 15, %v50_v22  ;;  %v3260_v30 = vand.u32 15, %v51_v23  ;;  %v3262_v31 = vand.u32 15, %v52_v24  ;;  %vm180_vm5 = vcmp.ge.s32.totalorder %v3252_v25, 1  ;;  %2720 = vmatpush3.bf16.msra.mxu0 %v2971_v5 }
  0x16   :  { %vm464_vm11 = vcmp.ge.s32.totalorder %v3252_v25, 2  ;;  %vm749_vm14 = vcmp.ge.s32.totalorder %v3252_v25, 4  ;;  %v2552_v25 = vld [vmem:[%s3918_s4 + $0x5] ss:$0 sm:$0xff]  ;;  %vm1564_vm15 = vcmp.lt.s32.totalorder %v3246_v21, 6 }
  0x17   :  { %vm1303_vm4 = vcmp.lt.s32.totalorder %v3254_v26, 15  ;;  %vm182_vm6 = vcmp.ge.s32.totalorder %v3260_v30, 1  ;;  %vm1305_vm7 = vcmp.lt.s32.totalorder %v3262_v31, 15  ;;  %vm466_vm10 = vcmp.ge.s32.totalorder %v3260_v30, 2 }
  0x18   :  { %vm751_vm13 = vcmp.ge.s32.totalorder %v3260_v30, 4  ;;  %v2976_v30 = vld [vmem:[%s3917_s3 + $0x30] sm:$0xff]   ;;  %vm1572_vm0 = vcmp.lt.s32.totalorder %v3262_v31, 14 }
  0xe7   :  { %v2711_v9 = vpop.f32.mrb[0].mxu0 }
  0xe8   :  { %v156_v11 = vpop.f32.mrb[1].mxu0  ;;  %v3240_v18 = vadd.f32 %v2711_v9, %v2505_v10 }
  0xe9   :  { %v2712_v12 = vpop.f32.mrb[2].mxu0  ;;  %v3232_v14 = vadd.f32 %v2505_v10, %v156_v11 }
  0xea   :  { %v159_v13 = vpop.f32.mrb[3].mxu0  ;;  %v3236_v16 = vadd.f32 %v2712_v12, %v2505_v10  ;;  %v1295_v32 = vrot.slane %v3240_v18, 1  ;;  %v173_v39 = vrot.slane %v3240_v18, 7 }
  0xeb   :  { %v3234_v15 = vadd.f32 %v2505_v10, %v159_v13  ;;  %v171_v29 = vrot.slane %v3232_v14, 7  ;;  %v1293_v33 = vrot.slane %v3232_v14, 1 }
  0xec   :  { %v2825_v19 = vpack.i.bf16 %v3236_v16, %v3240_v18  ;;  %v174_v28 = vrot.slane %v3236_v16, 7  ;;  %v1296_v34 = vrot.slane %v3236_v16, 1 }
  0xed   :  { %v2820_v17 = vpack.i.bf16 %v3234_v15, %v3232_v14  ;;  %v1294_v27 = vrot.slane %v3234_v15, 1  ;;  %v172_v35 = vrot.slane %v3234_v15, 7 }
  0xee   :  { %v179_v37 = vsel %vm175_vm3, %v174_v28, %v171_v29  ;;  %v1301_v43 = vsel %vm1297_vm2, %v1296_v34, %v1293_v33  ;;  %v176_v57 = vsel %vm175_vm3, %v173_v39, %v174_v28  ;;  %v1298_v59 = vsel %vm1297_vm2, %v1295_v32, %v1296_v34 }
  0xef   :  { %2821 = vrot.lane.b32.xlu0 %v2820_v17, %s3157_s0  ;;  %v1299_v36 = vsel %vm1297_vm2, %v1294_v27, %v1295_v32  ;;  %v1300_v42 = vsel %vm1297_vm2, %v1293_v33, %v1294_v27  ;;  %v177_v45 = vsel %vm175_vm3, %v172_v35, %v173_v39  ;;  %v178_v46 = vsel %vm175_vm3, %v171_v29, %v172_v35 }
  0xf0   :  { %v1315_v44 = vsel %vm1303_vm4, %v1299_v36, 0.0  ;;  %v192_v47 = vsel %vm180_vm5, %v179_v37, 0.0  ;;  %v194_v58 = vsel %vm182_vm6, %v177_v45, 0.0  ;;  %v1317_v60 = vsel %vm1305_vm7, %v1301_v43, 0.0 }
  0xf3   :  { %2826 = vrot.lane.b32.xlu0 %v2825_v19, %s3157_s0 }
 0x161   :  { %v2822_v38 = vpop.permute.xlu0 %2821 }
 0x162   :  { %v2824_v40 = vunpack.i.h.bf16 %v2822_v38  ;;  %v2823_v41 = vunpack.i.l.bf16 %v2822_v38 }
 0x164   :  { %v3291_v48 = vsel %vm111_vm1, %v1315_v44, %v2824_v40  ;;  %v3294_v49 = vsel %vm111_vm1, %v1300_v42, %v2823_v41  ;;  %v212_v50 = vsel %vm111_vm1, %v192_v47, %v2823_v41  ;;  %v213_v51 = vsel %vm111_vm1, %v178_v46, %v2824_v40 }
 0x165   :  { %v1322_v52 = vpack.c.bf16 %v3291_v48, %v3294_v49  ;;  %v2827_v53 = vpop.permute.xlu0 %2826  ;;  %v216_v54 = vpack.c.bf16 %v213_v51, %v212_v50 }
 0x166   :  { %v2829_v55 = vunpack.i.h.bf16 %v2827_v53  ;;  %v2828_v56 = vunpack.i.l.bf16 %v2827_v53  ;;  %v2972_v53 = vld [vmem:[%s3917_s3 + $0x10] sm:$0xff]  }
 0x167   :  { %2715 = vmatprep.mubr.msk.bf16.mxu1 %vm233_vm8, %v216_v54  ;;  %2725 = vmatprep.subr.bf16.mxu1 %v2972_v53  ;;  %v2515_v54 = vld [vmem:[%s3918_s4 + $0x1] ss:$0 sm:$0xff] }
 0x168   :  { %v215_v61 = vsel %vm111_vm1, %v176_v57, %v2829_v55  ;;  %v214_v62 = vsel %vm111_vm1, %v194_v58, %v2828_v56  ;;  %v3312_v63 = vsel %vm111_vm1, %v1298_v59, %v2828_v56  ;;  %v3315_v0 = vsel %vm111_vm1, %v1317_v60, %v2829_v55 }
 0x169   :  { %v217_v1 = vpack.c.bf16 %v215_v61, %v214_v62  ;;  %v1323_v2 = vpack.c.bf16 %v3315_v0, %v3312_v63  ;;  %v2979_v63 = vld [vmem:[%s3917_s3 + $0x48] sm:$0xff]  }
 0x16b   :  { %2716 = vmatmul.mubr.msk.bf16.vlgmr.msra.gmra.mrb[0].mxu1 %vm233_vm8, %v217_v1 }
 0x16c   :  { %2726 = vmatpush3.bf16.msra.mxu1 %v2972_v53 }
 0x23e   :  { %v2717_v4 = vpop.f32.mrb[0].mxu1 }
 0x23f   :  { %v283_v6 = vadd.f32 %v2717_v4, %v2508_v3  ;;  %v274_v7 = vpop.f32.mrb[1].mxu1 }
 0x240   :  { %v275_v8 = vadd.f32 %v2508_v3, %v274_v7  ;;  %v2718_v9 = vpop.f32.mrb[2].mxu1 }
 0x241   :  { %v291_v10 = vmax.f32 %v283_v6, 0.0  ;;  %v286_v11 = vadd.f32 %v2718_v9, %v2508_v3  ;;  %v277_v12 = vpop.f32.mrb[3].mxu1 }
 0x242   :  { %v289_v13 = vmax.f32 %v275_v8, 0.0  ;;  %v278_v17 = vadd.f32 %v2508_v3, %v277_v12 }
 0x243   :  { %v292_v19 = vmax.f32 %v286_v11, 0.0  ;;  %v295_v23 = vrot.slane %v291_v10, 7 }
 0x244   :  { %v293_v20 = vrot.slane %v289_v13, 7  ;;  %v290_v22 = vmax.f32 %v278_v17, 0.0 }
 0x245   :  { %v2835_v24 = vpack.i.bf16 %v292_v19, %v291_v10  ;;  %v296_v27 = vrot.slane %v292_v19, 7 }
 0x246   :  { %v294_v28 = vrot.slane %v290_v22, 7  ;;  %v2830_v29 = vpack.i.bf16 %v290_v22, %v289_v13 }
 0x247   :  { %v297_v32 = vsel %vm175_vm3, %v295_v23, %v296_v27  ;;  %v300_v33 = vsel %vm175_vm3, %v296_v27, %v293_v20 }
 0x248   :  { %v298_v34 = vsel %vm175_vm3, %v294_v28, %v295_v23  ;;  %v299_v35 = vsel %vm175_vm3, %v293_v20, %v294_v28  ;;  %2831 = vrot.lane.b32.xlu1 %v2830_v29, %s3157_s0  ;;  %v301_v39 = vsel %vm180_vm5, %v300_v33, 0.0  ;;  %vm1854_vm3 = vcmp.lt.s32.totalorder %v3262_v31, 12  ;;  %v2984_v31 = vld [vmem:[%s3917_s3 + $0x70] sm:$0xff]  }
 0x249   :  { %v303_v46 = vsel %vm182_vm6, %v298_v34, 0.0  ;;  %vm3159_vm5 = vmmov 0   ;;  %vm2401_vm6 = vcmask 1041409  }
 0x24c   :  { %2836 = vrot.lane.b32.xlu1 %v2835_v24, %s3157_s0 }
 0x2ba   :  { %v2832_v36 = vpop.permute.xlu1 %2831 }
 0x2bb   :  { %v2834_v37 = vunpack.i.h.bf16 %v2832_v36  ;;  %v2833_v38 = vunpack.i.l.bf16 %v2832_v36 }
 0x2bd   :  { %v321_v40 = vsel %vm111_vm1, %v301_v39, %v2833_v38  ;;  %v322_v41 = vsel %vm111_vm1, %v299_v35, %v2834_v37 }
 0x2be   :  { %v325_v42 = vpack.c.bf16 %v322_v41, %v321_v40  ;;  %v2837_v43 = vpop.permute.xlu1 %2836 }
 0x2bf   :  { %v2839_v44 = vunpack.i.h.bf16 %v2837_v43  ;;  %v2838_v45 = vunpack.i.l.bf16 %v2837_v43 }
 0x2c0   :  { %2721 = vmatprep.mubr.msk.bf16.mxu0 %vm233_vm8, %v325_v42 }
 0x2c1   :  { %v324_v47 = vsel %vm111_vm1, %v297_v32, %v2839_v44  ;;  %v323_v50 = vsel %vm111_vm1, %v303_v46, %v2838_v45 }
 0x2c2   :  { %v326_v51 = vpack.c.bf16 %v324_v47, %v323_v50 }
 0x2c4   :  { %2722 = vmatmul.mubr.msk.bf16.vlgmr.msra.gmra.mrb[4].mxu0 %vm233_vm8, %v326_v51 }
 0x397   :  { %v2723_v55 = vpop.f32.mrb[4].mxu0 }
 0x398   :  { %v393_v56 = vadd.f32 %v2723_v55, %v2515_v54  ;;  %v384_v57 = vpop.f32.mrb[5].mxu0 }
 0x399   :  { %v385_v58 = vadd.f32 %v2515_v54, %v384_v57  ;;  %v2724_v59 = vpop.f32.mrb[6].mxu0 }
 0x39a   :  { %v401_v60 = vmax.f32 %v393_v56, 0.0  ;;  %v396_v61 = vadd.f32 %v2724_v59, %v2515_v54  ;;  %v387_v62 = vpop.f32.mrb[7].mxu0 }
 0x39b   :  { %v399_v1 = vmax.f32 %v385_v58, 0.0  ;;  %v388_v3 = vadd.f32 %v2515_v54, %v387_v62  ;;  %v2973_v62 = vld [vmem:[%s3917_s3 + $0x18] sm:$0xff]  }
 0x39c   :  { %v2521_v4 = vmul.f32 -1.442695, %v401_v60  ;;  %v402_v5 = vmax.f32 %v396_v61, 0.0  ;;  %2731 = vmatprep.subr.bf16.mxu0 %v2973_v62 }
 0x39d   :  { %v2519_v6 = vmul.f32 -1.442695, %v399_v1  ;;  %v400_v7 = vmax.f32 %v388_v3, 0.0  ;;  %2732 = vmatpush3.bf16.msra.mxu0 %v2973_v62  ;;  %v2526_v1 = vld [vmem:[%s3918_s4 + $0x2] ss:$0 sm:$0xff] }
 0x39e   :  { %2986 = vpow2.f32 %v2521_v4  ;;  %v2522_v8 = vmul.f32 -1.442695, %v402_v5 }
 0x39f   :  { %2988 = vpow2.f32 %v2519_v6  ;;  %v2520_v9 = vmul.f32 -1.442695, %v400_v7 }
 0x3a0   :  { %2990 = vpow2.f32 %v2522_v8 }
 0x3a1   :  { %2992 = vpow2.f32 %v2520_v9 }
 0x3a8   :  { %v2987_v10 = vpop.eup %2986 }
 0x3a9   :  { %v2989_v11 = vpop.eup %2988  ;;  %v417_v12 = vadd.f32 1.0, %v2987_v10 }
 0x3aa   :  { %v2991_v13 = vpop.eup %2990  ;;  %v415_v17 = vadd.f32 1.0, %v2989_v11 }
 0x3ab   :  { %v2993_v19 = vpop.eup %2992  ;;  %2994 = vrcp.f32 %v417_v12  ;;  %v418_v20 = vadd.f32 1.0, %v2991_v13 }
 0x3ac   :  { %2996 = vrcp.f32 %v415_v17  ;;  %v416_v22 = vadd.f32 1.0, %v2993_v19 }
 0x3ad   :  { %2998 = vrcp.f32 %v418_v20 }
 0x3ae   :  { %3000 = vrcp.f32 %v416_v22 }
 0x3b5   :  { %v2995_v23 = vpop.eup %2994 }
 0x3b6   :  { %v2997_v24 = vpop.eup %2996  ;;  %v3353_v29 = vmul.f32 %v2995_v23, %v3240_v18 }
 0x3b7   :  { %v2999_v27 = vpop.eup %2998  ;;  %v3359_v33 = vmul.f32 %v2997_v24, %v3232_v14 }
 0x3b8   :  { %v3001_v28 = vpop.eup %3000  ;;  %v3356_v32 = vmul.f32 %v2999_v27, %v3236_v16  ;;  %v457_v40 = vrot.slane %v3353_v29, 6 }
 0x3b9   :  { %v3362_v34 = vmul.f32 %v3001_v28, %v3234_v15  ;;  %v455_v39 = vrot.slane %v3359_v33, 6 }
 0x3ba   :  { %v2845_v35 = vpack.i.bf16 %v3356_v32, %v3353_v29  ;;  %v458_v38 = vrot.slane %v3356_v32, 6 }
 0x3bb   :  { %v2840_v36 = vpack.i.bf16 %v3362_v34, %v3359_v33  ;;  %v456_v37 = vrot.slane %v3362_v34, 6 }
 0x3bc   :  { %2846 = vrot.lane.b32.xlu1 %v2845_v35, %s3157_s0  ;;  %v463_v43 = vsel %vm459_vm9, %v458_v38, %v455_v39  ;;  %v460_v47 = vsel %vm459_vm9, %v457_v40, %v458_v38 }
 0x3bd   :  { %2841 = vrot.lane.b32.xlu0 %v2840_v36, %s3157_s0  ;;  %v461_v41 = vsel %vm459_vm9, %v456_v37, %v457_v40  ;;  %v462_v56 = vsel %vm459_vm9, %v455_v39, %v456_v37  ;;  %v476_v57 = vsel %vm464_vm11, %v463_v43, 0.0 }
 0x3be   :  { %v478_v50 = vsel %vm466_vm10, %v461_v41, 0.0 }
 0x42e   :  { %v2847_v42 = vpop.permute.xlu1 %2846 }
 0x42f   :  { %v2849_v44 = vunpack.i.h.bf16 %v2847_v42  ;;  %v2848_v45 = vunpack.i.l.bf16 %v2847_v42  ;;  %v2842_v46 = vpop.permute.xlu0 %2841 }
 0x430   :  { %v2844_v51 = vunpack.i.h.bf16 %v2842_v46  ;;  %v2843_v53 = vunpack.i.l.bf16 %v2842_v46 }
 0x431   :  { %v498_v54 = vsel %vm111_vm1, %v478_v50, %v2848_v45  ;;  %v499_v55 = vsel %vm111_vm1, %v460_v47, %v2849_v44 }
 0x432   :  { %v496_v58 = vsel %vm111_vm1, %v476_v57, %v2843_v53  ;;  %v497_v59 = vsel %vm111_vm1, %v462_v56, %v2844_v51  ;;  %v501_v61 = vpack.c.bf16 %v499_v55, %v498_v54  ;;  %v2974_v55 = vld [vmem:[%s3917_s3 + $0x20] sm:$0xff]  }
 0x433   :  { %v500_v60 = vpack.c.bf16 %v497_v59, %v496_v58  ;;  %2737 = vmatprep.subr.bf16.mxu1 %v2974_v55  ;;  %v2533_v56 = vld [vmem:[%s3918_s4 + $0x3] ss:$0 sm:$0xff] }
 0x435   :  { %2727 = vmatprep.mubr.msk.bf16.mxu1 %vm233_vm8, %v500_v60 }
 0x436   :  { %2728 = vmatmul.mubr.msk.bf16.vlgmr.msra.gmra.mrb[4].mxu1 %vm233_vm8, %v501_v61 }
 0x437   :  { %2738 = vmatpush3.bf16.msra.mxu1 %v2974_v55 }
 0x438   :  { %2749 = vmatprep.subr.bf16.mxu1 %v2976_v30 }
 0x509   :  { %v2729_v3 = vpop.f32.mrb[4].mxu1 }
 0x50a   :  { %v568_v4 = vadd.f32 %v2729_v3, %v2526_v1  ;;  %v559_v5 = vpop.f32.mrb[5].mxu1 }
 0x50b   :  { %v560_v6 = vadd.f32 %v2526_v1, %v559_v5  ;;  %v2730_v7 = vpop.f32.mrb[6].mxu1 }
 0x50c   :  { %v576_v8 = vmax.f32 %v568_v4, 0.0  ;;  %v571_v9 = vadd.f32 %v2730_v7, %v2526_v1  ;;  %v562_v10 = vpop.f32.mrb[7].mxu1 }
 0x50d   :  { %v574_v11 = vmax.f32 %v560_v6, 0.0  ;;  %v563_v12 = vadd.f32 %v2526_v1, %v562_v10 }
 0x50e   :  { %v577_v13 = vmax.f32 %v571_v9, 0.0  ;;  %v580_v20 = vrot.slane %v576_v8, 6 }
 0x50f   :  { %v578_v17 = vrot.slane %v574_v11, 6  ;;  %v575_v19 = vmax.f32 %v563_v12, 0.0 }
 0x510   :  { %v2855_v22 = vpack.i.bf16 %v577_v13, %v576_v8  ;;  %v581_v23 = vrot.slane %v577_v13, 6 }
 0x511   :  { %v579_v24 = vrot.slane %v575_v19, 6  ;;  %v2850_v27 = vpack.i.bf16 %v575_v19, %v574_v11 }
 0x512   :  { %v582_v28 = vsel %vm459_vm9, %v580_v20, %v581_v23  ;;  %v585_v35 = vsel %vm459_vm9, %v581_v23, %v578_v17  ;;  %2856 = vrot.lane.b32.xlu1 %v2855_v22, %s3157_s0 }
 0x513   :  { %v583_v36 = vsel %vm459_vm9, %v579_v24, %v580_v20  ;;  %v584_v37 = vsel %vm459_vm9, %v578_v17, %v579_v24  ;;  %2851 = vrot.lane.b32.xlu0 %v2850_v27, %s3157_s0  ;;  %v586_v47 = vsel %vm464_vm11, %v585_v35, 0.0 }
 0x514   :  { %v588_v42 = vsel %vm466_vm10, %v583_v36, 0.0 }
 0x584   :  { %v2857_v38 = vpop.permute.xlu1 %2856 }
 0x585   :  { %v2859_v39 = vunpack.i.h.bf16 %v2857_v38  ;;  %v2858_v40 = vunpack.i.l.bf16 %v2857_v38  ;;  %v2852_v41 = vpop.permute.xlu0 %2851 }
 0x586   :  { %v2854_v43 = vunpack.i.h.bf16 %v2852_v41  ;;  %v2853_v44 = vunpack.i.l.bf16 %v2852_v41 }
 0x587   :  { %v608_v45 = vsel %vm111_vm1, %v588_v42, %v2858_v40  ;;  %v609_v46 = vsel %vm111_vm1, %v582_v28, %v2859_v39 }
 0x588   :  { %v611_v50 = vpack.c.bf16 %v609_v46, %v608_v45  ;;  %v606_v51 = vsel %vm111_vm1, %v586_v47, %v2853_v44  ;;  %v607_v53 = vsel %vm111_vm1, %v584_v37, %v2854_v43 }
 0x589   :  { %v610_v54 = vpack.c.bf16 %v607_v53, %v606_v51 }
 0x58b   :  { %2733 = vmatprep.mubr.msk.bf16.mxu0 %vm233_vm8, %v610_v54 }
 0x58c   :  { %2734 = vmatmul.mubr.msk.bf16.vlgmr.msra.gmra.mrb[8].mxu0 %vm233_vm8, %v611_v50 }
 0x65f   :  { %v2735_v57 = vpop.f32.mrb[8].mxu0 }
 0x660   :  { %v678_v58 = vadd.f32 %v2735_v57, %v2533_v56  ;;  %v669_v59 = vpop.f32.mrb[9].mxu0 }
 0x661   :  { %v670_v60 = vadd.f32 %v2533_v56, %v669_v59  ;;  %v2736_v61 = vpop.f32.mrb[10].mxu0 }
 0x662   :  { %v686_v62 = vmax.f32 %v678_v58, 0.0  ;;  %v681_v1 = vadd.f32 %v2736_v61, %v2533_v56  ;;  %v672_v3 = vpop.f32.mrb[11].mxu0 }
 0x663   :  { %v684_v4 = vmax.f32 %v670_v60, 0.0  ;;  %v673_v5 = vadd.f32 %v2533_v56, %v672_v3 }
 0x664   :  { %v2539_v6 = vmul.f32 -1.442695, %v686_v62  ;;  %v687_v7 = vmax.f32 %v681_v1, 0.0 }
 0x665   :  { %v2537_v8 = vmul.f32 -1.442695, %v684_v4  ;;  %v685_v9 = vmax.f32 %v673_v5, 0.0 }
 0x666   :  { %3002 = vpow2.f32 %v2539_v6  ;;  %v2540_v10 = vmul.f32 -1.442695, %v687_v7  ;;  %v2975_v7 = vld [vmem:[%s3917_s3 + $0x28] sm:$0xff]  }
 0x667   :  { %3004 = vpow2.f32 %v2537_v8  ;;  %v2538_v11 = vmul.f32 -1.442695, %v685_v9  ;;  %2743 = vmatprep.subr.bf16.mxu0 %v2975_v7  ;;  %v2545_v8 = vld [vmem:[%s3918_s4 + $0x4] ss:$0 sm:$0xff] }
 0x668   :  { %3006 = vpow2.f32 %v2540_v10  ;;  %2744 = vmatpush3.bf16.msra.mxu0 %v2975_v7 }
 0x669   :  { %3008 = vpow2.f32 %v2538_v11 }
 0x670   :  { %v3003_v12 = vpop.eup %3002 }
 0x671   :  { %v3005_v13 = vpop.eup %3004  ;;  %v702_v17 = vadd.f32 1.0, %v3003_v12 }
 0x672   :  { %v3007_v19 = vpop.eup %3006  ;;  %v700_v20 = vadd.f32 1.0, %v3005_v13 }
 0x673   :  { %v3009_v22 = vpop.eup %3008  ;;  %3010 = vrcp.f32 %v702_v17  ;;  %v703_v23 = vadd.f32 1.0, %v3007_v19 }
 0x674   :  { %3012 = vrcp.f32 %v700_v20  ;;  %v701_v24 = vadd.f32 1.0, %v3009_v22 }
 0x675   :  { %3014 = vrcp.f32 %v703_v23 }
 0x676   :  { %3016 = vrcp.f32 %v701_v24 }
 0x67d   :  { %v3011_v27 = vpop.eup %3010 }
 0x67e   :  { %v3013_v28 = vpop.eup %3012  ;;  %v3428_v37 = vmul.f32 %v3011_v27, %v3353_v29 }
 0x67f   :  { %v3015_v35 = vpop.eup %3014  ;;  %v3434_v39 = vmul.f32 %v3013_v28, %v3359_v33 }
 0x680   :  { %v3017_v36 = vpop.eup %3016  ;;  %v3431_v38 = vmul.f32 %v3015_v35, %v3356_v32  ;;  %v742_v46 = vrot.slane %v3428_v37, 4 }
 0x681   :  { %v3437_v40 = vmul.f32 %v3017_v36, %v3362_v34  ;;  %v740_v45 = vrot.slane %v3434_v39, 4 }
 0x682   :  { %v2865_v41 = vpack.i.bf16 %v3431_v38, %v3428_v37  ;;  %v743_v44 = vrot.slane %v3431_v38, 4 }
 0x683   :  { %v2860_v42 = vpack.i.bf16 %v3437_v40, %v3434_v39  ;;  %v741_v43 = vrot.slane %v3437_v40, 4 }
 0x684   :  { %2866 = vrot.lane.b32.xlu1 %v2865_v41, %s3157_s0  ;;  %v748_v51 = vsel %vm744_vm12, %v743_v44, %v740_v45  ;;  %v745_v56 = vsel %vm744_vm12, %v742_v46, %v743_v44 }
 0x685   :  { %2861 = vrot.lane.b32.xlu0 %v2860_v42, %s3157_s0  ;;  %v746_v47 = vsel %vm744_vm12, %v741_v43, %v742_v46  ;;  %v747_v62 = vsel %vm744_vm12, %v740_v45, %v741_v43  ;;  %v761_v1 = vsel %vm749_vm14, %v748_v51, 0.0 }
 0x686   :  { %v763_v57 = vsel %vm751_vm13, %v746_v47, 0.0 }
 0x6f6   :  { %v2867_v50 = vpop.permute.xlu1 %2866 }
 0x6f7   :  { %v2869_v53 = vunpack.i.h.bf16 %v2867_v50  ;;  %v2868_v54 = vunpack.i.l.bf16 %v2867_v50  ;;  %v2862_v55 = vpop.permute.xlu0 %2861 }
 0x6f8   :  { %v2864_v58 = vunpack.i.h.bf16 %v2862_v55  ;;  %v2863_v59 = vunpack.i.l.bf16 %v2862_v55 }
 0x6f9   :  { %v783_v60 = vsel %vm111_vm1, %v763_v57, %v2868_v54  ;;  %v784_v61 = vsel %vm111_vm1, %v745_v56, %v2869_v53 }
 0x6fa   :  { %v781_v3 = vsel %vm111_vm1, %v761_v1, %v2863_v59  ;;  %v782_v4 = vsel %vm111_vm1, %v747_v62, %v2864_v58  ;;  %v786_v6 = vpack.c.bf16 %v784_v61, %v783_v60 }
 0x6fb   :  { %v785_v5 = vpack.c.bf16 %v782_v4, %v781_v3 }
 0x6fd   :  { %2739 = vmatprep.mubr.msk.bf16.mxu1 %vm233_vm8, %v785_v5 }
 0x6fe   :  { %2740 = vmatmul.mubr.msk.bf16.vlgmr.msra.gmra.mrb[8].mxu1 %vm233_vm8, %v786_v6 }
 0x6ff   :  { %2750 = vmatpush3.bf16.msra.mxu1 %v2976_v30 }
 0x7d1   :  { %v2741_v9 = vpop.f32.mrb[8].mxu1 }
 0x7d2   :  { %v853_v10 = vadd.f32 %v2741_v9, %v2545_v8  ;;  %v844_v11 = vpop.f32.mrb[9].mxu1 }
 0x7d3   :  { %v845_v12 = vadd.f32 %v2545_v8, %v844_v11  ;;  %v2742_v13 = vpop.f32.mrb[10].mxu1 }
 0x7d4   :  { %v861_v17 = vmax.f32 %v853_v10, 0.0  ;;  %v856_v19 = vadd.f32 %v2742_v13, %v2545_v8  ;;  %v847_v20 = vpop.f32.mrb[11].mxu1 }
 0x7d5   :  { %v859_v22 = vmax.f32 %v845_v12, 0.0  ;;  %v848_v23 = vadd.f32 %v2545_v8, %v847_v20 }
 0x7d6   :  { %v862_v24 = vmax.f32 %v856_v19, 0.0  ;;  %v865_v35 = vrot.slane %v861_v17, 4 }
 0x7d7   :  { %v863_v27 = vrot.slane %v859_v22, 4  ;;  %v860_v28 = vmax.f32 %v848_v23, 0.0 }
 0x7d8   :  { %v2875_v36 = vpack.i.bf16 %v862_v24, %v861_v17  ;;  %v866_v41 = vrot.slane %v862_v24, 4 }
 0x7d9   :  { %v864_v42 = vrot.slane %v860_v28, 4  ;;  %v2870_v43 = vpack.i.bf16 %v860_v28, %v859_v22 }
 0x7da   :  { %v867_v44 = vsel %vm744_vm12, %v865_v35, %v866_v41  ;;  %v870_v45 = vsel %vm744_vm12, %v866_v41, %v863_v27  ;;  %2876 = vrot.lane.b32.xlu1 %v2875_v36, %s3157_s0 }
 0x7db   :  { %v868_v46 = vsel %vm744_vm12, %v864_v42, %v865_v35  ;;  %v869_v47 = vsel %vm744_vm12, %v863_v27, %v864_v42  ;;  %2871 = vrot.lane.b32.xlu0 %v2870_v43, %s3157_s0  ;;  %v871_v60 = vsel %vm749_vm14, %v870_v45, 0.0 }
 0x7dc   :  { %v873_v55 = vsel %vm751_vm13, %v868_v46, 0.0  ;;  %v2977_v46 = vld [vmem:[%s3917_s3 + $0x40] sm:$0xff]  }
 0x7dd   :  { %2761 = vmatprep.subr.bf16.mxu1 %v2977_v46 }
 0x84c   :  { %v2877_v50 = vpop.permute.xlu1 %2876 }
 0x84d   :  { %v2879_v51 = vunpack.i.h.bf16 %v2877_v50  ;;  %v2878_v53 = vunpack.i.l.bf16 %v2877_v50  ;;  %v2872_v54 = vpop.permute.xlu0 %2871 }
 0x84e   :  { %v2874_v56 = vunpack.i.h.bf16 %v2872_v54  ;;  %v2873_v57 = vunpack.i.l.bf16 %v2872_v54 }
 0x84f   :  { %v893_v58 = vsel %vm111_vm1, %v873_v55, %v2878_v53  ;;  %v894_v59 = vsel %vm111_vm1, %v867_v44, %v2879_v51 }
 0x850   :  { %v896_v61 = vpack.c.bf16 %v894_v59, %v893_v58  ;;  %v891_v62 = vsel %vm111_vm1, %v871_v60, %v2873_v57  ;;  %v892_v1 = vsel %vm111_vm1, %v869_v47, %v2874_v56 }
 0x851   :  { %v895_v3 = vpack.c.bf16 %v892_v1, %v891_v62 }
 0x853   :  { %2745 = vmatprep.mubr.msk.bf16.mxu0 %vm233_vm8, %v895_v3 }
 0x854   :  { %2746 = vmatmul.mubr.msk.bf16.vlgmr.msra.gmra.mrb[12].mxu0 %vm233_vm8, %v896_v61 }
 0x927   :  { %v2747_v4 = vpop.f32.mrb[12].mxu0 }
 0x928   :  { %v963_v5 = vadd.f32 %v2747_v4, %v2552_v25  ;;  %v954_v6 = vpop.f32.mrb[13].mxu0 }
 0x929   :  { %v955_v7 = vadd.f32 %v2552_v25, %v954_v6  ;;  %v2748_v8 = vpop.f32.mrb[14].mxu0 }
 0x92a   :  { %v971_v9 = vmax.f32 %v963_v5, 0.0  ;;  %v966_v10 = vadd.f32 %v2748_v8, %v2552_v25  ;;  %v957_v11 = vpop.f32.mrb[15].mxu0  ;;  %v2978_v8 = vld [vmem:[%s3917_s3 + $0x38] sm:$0xff]  }
 0x92b   :  { %v969_v12 = vmax.f32 %v955_v7, 0.0  ;;  %v958_v13 = vadd.f32 %v2552_v25, %v957_v11  ;;  %2755 = vmatprep.subr.bf16.mxu0 %v2978_v8 }
 0x92c   :  { %v2558_v17 = vmul.f32 -1.442695, %v971_v9  ;;  %v972_v19 = vmax.f32 %v966_v10, 0.0  ;;  %2756 = vmatpush3.bf16.msra.mxu0 %v2978_v8  ;;  %v2564_v9 = vld [vmem:[%s3918_s4 + $0x6] ss:$0 sm:$0xff] }
 0x92d   :  { %v2556_v20 = vmul.f32 -1.442695, %v969_v12  ;;  %v970_v22 = vmax.f32 %v958_v13, 0.0  ;;  %2767 = vmatprep.subr.bf16.mxu0 %v2979_v63 }
 0x92e   :  { %3018 = vpow2.f32 %v2558_v17  ;;  %v2559_v23 = vmul.f32 -1.442695, %v972_v19 }
 0x92f   :  { %3020 = vpow2.f32 %v2556_v20  ;;  %v2557_v24 = vmul.f32 -1.442695, %v970_v22  ;;  %v2583_v22 = vld [vmem:[%s3918_s4 + $0x8] ss:$0 sm:$0xff] }
 0x930   :  { %3022 = vpow2.f32 %v2559_v23 }
 0x931   :  { %3024 = vpow2.f32 %v2557_v24 }
 0x938   :  { %v3019_v27 = vpop.eup %3018 }
 0x939   :  { %v3021_v28 = vpop.eup %3020  ;;  %v987_v35 = vadd.f32 1.0, %v3019_v27 }
 0x93a   :  { %v3023_v36 = vpop.eup %3022  ;;  %v985_v41 = vadd.f32 1.0, %v3021_v28 }
 0x93b   :  { %v3025_v42 = vpop.eup %3024  ;;  %3026 = vrcp.f32 %v987_v35  ;;  %v988_v43 = vadd.f32 1.0, %v3023_v36 }
 0x93c   :  { %3028 = vrcp.f32 %v985_v41  ;;  %v986_v44 = vadd.f32 1.0, %v3025_v42 }
 0x93d   :  { %3030 = vrcp.f32 %v988_v43 }
 0x93e   :  { %3032 = vrcp.f32 %v986_v44 }
 0x945   :  { %v3027_v45 = vpop.eup %3026 }
 0x946   :  { %v3029_v47 = vpop.eup %3028  ;;  %v3506_v53 = vmul.f32 %v3027_v45, %v3428_v37 }
 0x947   :  { %v3031_v50 = vpop.eup %3030  ;;  %v3512_v55 = vmul.f32 %v3029_v47, %v3434_v39 }
 0x948   :  { %v3033_v51 = vpop.eup %3032  ;;  %v3509_v54 = vmul.f32 %v3031_v50, %v3431_v38 }
 0x949   :  { %v3515_v56 = vmul.f32 %v3033_v51, %v3437_v40 }
 0x94a   :  { %v2885_v57 = vpack.i.bf16 %v3509_v54, %v3506_v53 }
 0x94b   :  { %v2880_v58 = vpack.i.bf16 %v3515_v56, %v3512_v55 }
 0x94c   :  { %2886 = vrot.lane.b32.xlu1 %v2885_v57, %s3157_s0 }
 0x94d   :  { %2881 = vrot.lane.b32.xlu0 %v2880_v58, %s3157_s0 }
 0x9be   :  { %v2887_v59 = vpop.permute.xlu1 %2886 }
 0x9bf   :  { %v2889_v60 = vunpack.i.h.bf16 %v2887_v59  ;;  %v2888_v61 = vunpack.i.l.bf16 %v2887_v59  ;;  %v2882_v62 = vpop.permute.xlu0 %2881 }
 0x9c0   :  { %v2884_v1 = vunpack.i.h.bf16 %v2882_v62  ;;  %v2883_v3 = vunpack.i.l.bf16 %v2882_v62 }
 0x9c1   :  { %v1060_v30 = vsel %vm111_vm1, %v3506_v53, %v2889_v60  ;;  %v1059_v25 = vsel %vm111_vm1, 0.0, %v2888_v61 }
 0x9c2   :  { %v1058_v4 = vsel %vm111_vm1, %v3512_v55, %v2884_v1  ;;  %v1057_v5 = vsel %vm111_vm1, 0.0, %v2883_v3  ;;  %v1062_v7 = vpack.c.bf16 %v1060_v30, %v1059_v25 }
 0x9c3   :  { %v1061_v6 = vpack.c.bf16 %v1058_v4, %v1057_v5 }
 0x9c5   :  { %2751 = vmatprep.mubr.msk.bf16.mxu1 %vm233_vm8, %v1061_v6 }
 0x9c6   :  { %2752 = vmatmul.mubr.msk.bf16.vlgmr.msra.gmra.mrb[12].mxu1 %vm233_vm8, %v1062_v7 }
 0x9c7   :  { %2762 = vmatpush3.bf16.msra.mxu1 %v2977_v46  ;;  %2763 = vmatprep.mubr.msk.bf16.mxu1 %vm233_vm8, %v1322_v52 }
 0x9ce   :  { %2764 = vmatmul.mubr.msk.bf16.vlgmr.msra.gmra.mrb[16].mxu1 %vm233_vm8, %v1323_v2 }
 0xa99   :  { %v2753_v10 = vpop.f32.mrb[12].mxu1 }
 0xa9a   :  { %v1129_v11 = vadd.f32 %v2753_v10, %v2564_v9  ;;  %v1120_v48 = vpop.f32.mrb[13].mxu1 }
 0xa9b   :  { %v1121_v49 = vadd.f32 %v2564_v9, %v1120_v48  ;;  %v2754_v52 = vpop.f32.mrb[14].mxu1 }
 0xa9c   :  { %v1132_v0 = vadd.f32 %v2754_v52, %v2564_v9  ;;  %v1123_v2 = vpop.f32.mrb[15].mxu1  ;;  %v1137_v13 = vmax.f32 %v1129_v11, 0.0 }
 0xa9d   :  { %v1124_v12 = vadd.f32 %v2564_v9, %v1123_v2  ;;  %v1135_v19 = vmax.f32 %v1121_v49, 0.0 }
 0xa9e   :  { %v1138_v17 = vmax.f32 %v1132_v0, 0.0 }
 0xa9f   :  { %v1136_v20 = vmax.f32 %v1124_v12, 0.0 }
 0xaa0   :  { %v2895_v23 = vpack.i.bf16 %v1138_v17, %v1137_v13 }
 0xaa1   :  { %v2890_v24 = vpack.i.bf16 %v1136_v20, %v1135_v19  ;;  %v2765_v27 = vpop.f32.mrb[16].mxu1 }
 0xaa2   :  { %v1390_v28 = vadd.f32 %v2765_v27, %v2583_v22  ;;  %2896 = vrot.lane.b32.xlu1 %v2895_v23, %s3157_s0  ;;  %v1381_v35 = vpop.f32.mrb[17].mxu1 }
 0xaa3   :  { %v1382_v36 = vadd.f32 %v2583_v22, %v1381_v35  ;;  %v2766_v41 = vpop.f32.mrb[18].mxu1  ;;  %2891 = vrot.lane.b32.xlu0 %v2890_v24, %s3157_s0 }
 0xaa4   :  { %v1398_v42 = vmax.f32 %v1390_v28, 0.0  ;;  %v1393_v43 = vadd.f32 %v2766_v41, %v2583_v22  ;;  %v1384_v44 = vpop.f32.mrb[19].mxu1  ;;  %v2571_v41 = vld [vmem:[%s3918_s4 + $0x7] ss:$0 sm:$0xff] }
 0xaa5   :  { %v1396_v45 = vmax.f32 %v1382_v36, 0.0  ;;  %v1385_v46 = vadd.f32 %v2583_v22, %v1384_v44 }
 0xaa6   :  { %v1399_v47 = vmax.f32 %v1393_v43, 0.0  ;;  %v1402_v57 = vrot.slane %v1398_v42, 1 }
 0xaa7   :  { %v1400_v50 = vrot.slane %v1396_v45, 1  ;;  %v1397_v51 = vmax.f32 %v1385_v46, 0.0 }
 0xaa8   :  { %v2905_v58 = vpack.i.bf16 %v1399_v47, %v1398_v42  ;;  %v1403_v59 = vrot.slane %v1399_v47, 1 }
 0xaa9   :  { %v1401_v60 = vrot.slane %v1397_v51, 1  ;;  %v2900_v61 = vpack.i.bf16 %v1397_v51, %v1396_v45 }
 0xaaa   :  { %v1404_v62 = vsel %vm1297_vm2, %v1402_v57, %v1403_v59  ;;  %v1407_v1 = vsel %vm1297_vm2, %v1403_v59, %v1400_v50  ;;  %2906 = vrot.lane.b32.xlu1 %v2905_v58, %s3157_s0 }
 0xaab   :  { %v1405_v3 = vsel %vm1297_vm2, %v1401_v60, %v1402_v57  ;;  %v1406_v30 = vsel %vm1297_vm2, %v1400_v50, %v1401_v60  ;;  %2901 = vrot.lane.b32.xlu0 %v2900_v61, %s3157_s0  ;;  %vm1570_vm2 = vcmp.lt.s32.totalorder %v3254_v26, 14 }
 0xaac   :  { %v1409_v24 = vsel %vm1303_vm4, %v1405_v3, 0.0  ;;  %vm1852_vm4 = vcmp.lt.s32.totalorder %v3254_v26, 12  ;;  %v2626_v26 = vld [vmem:[%s3918_s4 + $0xd] ss:$0 sm:$0xff] }
 0xb14   :  { %v2897_v25 = vpop.permute.xlu1 %2896 }
 0xb15   :  { %v2899_v4 = vunpack.i.h.bf16 %v2897_v25  ;;  %v2898_v5 = vunpack.i.l.bf16 %v2897_v25  ;;  %v2892_v6 = vpop.permute.xlu0 %2891 }
 0xb16   :  { %v2894_v7 = vunpack.i.h.bf16 %v2892_v6  ;;  %v2893_v8 = vunpack.i.l.bf16 %v2892_v6 }
 0xb17   :  { %v1162_v9 = vsel %vm111_vm1, %v1137_v13, %v2899_v4  ;;  %v1161_v10 = vsel %vm111_vm1, 0.0, %v2898_v5  ;;  %v1411_v13 = vsel %vm1305_vm7, %v1407_v1, 0.0  ;;  %v2590_v1 = vld [vmem:[%s3918_s4 + $0x9] ss:$0 sm:$0xff]  ;;  %vm2475_vm7 = vcmask 58368  }
 0xb18   :  { %v1160_v11 = vsel %vm111_vm1, %v1135_v19, %v2894_v7  ;;  %v1159_v48 = vsel %vm111_vm1, 0.0, %v2893_v8  ;;  %v1164_v52 = vpack.c.bf16 %v1162_v9, %v1161_v10 }
 0xb19   :  { %v1163_v49 = vpack.c.bf16 %v1160_v11, %v1159_v48 }
 0xb1b   :  { %2757 = vmatprep.mubr.msk.bf16.mxu0 %vm233_vm8, %v1163_v49 }
 0xb1c   :  { %v2907_v0 = vpop.permute.xlu1 %2906  ;;  %2758 = vmatmul.mubr.msk.bf16.vlgmr.msra.gmra.mrb[16].mxu0 %vm233_vm8, %v1164_v52 }
 0xb1d   :  { %v2909_v2 = vunpack.i.h.bf16 %v2907_v0  ;;  %v2908_v12 = vunpack.i.l.bf16 %v2907_v0  ;;  %2768 = vmatpush3.bf16.msra.mxu0 %v2979_v63  ;;  %v2902_v17 = vpop.permute.xlu0 %2901  ;;  %v2980_v63 = vld [vmem:[%s3917_s3 + $0x50] sm:$0xff]  }
 0xb1e   :  { %v2904_v20 = vunpack.i.h.bf16 %v2902_v17  ;;  %v2903_v22 = vunpack.i.l.bf16 %v2902_v17  ;;  %2773 = vmatprep.subr.bf16.mxu1 %v2980_v63 }
 0xb1f   :  { %v1430_v19 = vsel %vm111_vm1, %v1404_v62, %v2908_v12  ;;  %v1431_v23 = vsel %vm111_vm1, %v1411_v13, %v2909_v2  ;;  %2774 = vmatpush3.bf16.msra.mxu1 %v2980_v63 }
 0xb20   :  { %v1433_v27 = vpack.c.bf16 %v1431_v23, %v1430_v19  ;;  %v1429_v28 = vsel %vm111_vm1, %v1409_v24, %v2904_v20  ;;  %v1428_v35 = vsel %vm111_vm1, %v1406_v30, %v2903_v22 }
 0xb21   :  { %v1432_v36 = vpack.c.bf16 %v1429_v28, %v1428_v35 }
 0xb23   :  { %2769 = vmatprep.mubr.msk.bf16.mxu0 %vm233_vm8, %v1432_v36 }
 0xb24   :  { %2770 = vmatmul.mubr.msk.bf16.vlgmr.msra.gmra.mrb[20].mxu0 %vm233_vm8, %v1433_v27 }
 0xbef   :  { %v2759_v42 = vpop.f32.mrb[16].mxu0 }
 0xbf0   :  { %v1231_v43 = vadd.f32 %v2759_v42, %v2571_v41  ;;  %v1222_v44 = vpop.f32.mrb[17].mxu0 }
 0xbf1   :  { %v1223_v45 = vadd.f32 %v2571_v41, %v1222_v44  ;;  %v2760_v46 = vpop.f32.mrb[18].mxu0 }
 0xbf2   :  { %v1239_v47 = vmax.f32 %v1231_v43, 0.0  ;;  %v1234_v50 = vadd.f32 %v2760_v46, %v2571_v41  ;;  %v1225_v51 = vpop.f32.mrb[19].mxu0 }
 0xbf3   :  { %v1237_v57 = vmax.f32 %v1223_v45, 0.0  ;;  %v1226_v58 = vadd.f32 %v2571_v41, %v1225_v51 }
 0xbf4   :  { %v2577_v59 = vmul.f32 -1.442695, %v1239_v47  ;;  %v1240_v60 = vmax.f32 %v1234_v50, 0.0 }
 0xbf5   :  { %v2575_v61 = vmul.f32 -1.442695, %v1237_v57  ;;  %v1238_v62 = vmax.f32 %v1226_v58, 0.0 }
 0xbf6   :  { %3034 = vpow2.f32 %v2577_v59  ;;  %v2578_v3 = vmul.f32 -1.442695, %v1240_v60 }
 0xbf7   :  { %3036 = vpow2.f32 %v2575_v61  ;;  %v2576_v30 = vmul.f32 -1.442695, %v1238_v62  ;;  %v2771_v25 = vpop.f32.mrb[20].mxu0 }
 0xbf8   :  { %3038 = vpow2.f32 %v2578_v3  ;;  %v1500_v4 = vadd.f32 %v2771_v25, %v2590_v1  ;;  %v1491_v5 = vpop.f32.mrb[21].mxu0 }
 0xbf9   :  { %3040 = vpow2.f32 %v2576_v30  ;;  %v1492_v6 = vadd.f32 %v2590_v1, %v1491_v5  ;;  %v2772_v7 = vpop.f32.mrb[22].mxu0 }
 0xbfa   :  { %v1508_v8 = vmax.f32 %v1500_v4, 0.0  ;;  %v1503_v9 = vadd.f32 %v2772_v7, %v2590_v1  ;;  %v1494_v10 = vpop.f32.mrb[23].mxu0 }
 0xbfb   :  { %v1506_v11 = vmax.f32 %v1492_v6, 0.0  ;;  %v1495_v48 = vadd.f32 %v2590_v1, %v1494_v10 }
 0xbfc   :  { %v2596_v49 = vmul.f32 -1.442695, %v1508_v8  ;;  %v1509_v52 = vmax.f32 %v1503_v9, 0.0 }
 0xbfd   :  { %v2594_v0 = vmul.f32 -1.442695, %v1506_v11  ;;  %v1507_v2 = vmax.f32 %v1495_v48, 0.0 }
 0xbfe   :  { %3042 = vpow2.f32 %v2596_v49  ;;  %v2597_v12 = vmul.f32 -1.442695, %v1509_v52 }
 0xbff   :  { %3044 = vpow2.f32 %v2594_v0  ;;  %v2595_v17 = vmul.f32 -1.442695, %v1507_v2 }
 0xc00   :  { %v3035_v13 = vpop.eup %3034  ;;  %3046 = vpow2.f32 %v2597_v12 }
 0xc01   :  { %v3037_v20 = vpop.eup %3036  ;;  %v1255_v22 = vadd.f32 1.0, %v3035_v13  ;;  %3048 = vpow2.f32 %v2595_v17 }
 0xc02   :  { %v3039_v19 = vpop.eup %3038  ;;  %v1253_v23 = vadd.f32 1.0, %v3037_v20 }
 0xc03   :  { %v3041_v24 = vpop.eup %3040  ;;  %3050 = vrcp.f32 %v1255_v22  ;;  %v1256_v27 = vadd.f32 1.0, %v3039_v19 }
 0xc04   :  { %3052 = vrcp.f32 %v1253_v23  ;;  %v1254_v28 = vadd.f32 1.0, %v3041_v24 }
 0xc05   :  { %3054 = vrcp.f32 %v1256_v27 }
 0xc06   :  { %3056 = vrcp.f32 %v1254_v28 }
 0xc08   :  { %v3043_v35 = vpop.eup %3042 }
 0xc09   :  { %v3045_v36 = vpop.eup %3044  ;;  %v1524_v63 = vadd.f32 1.0, %v3043_v35 }
 0xc0a   :  { %v3047_v41 = vpop.eup %3046  ;;  %v1522_v42 = vadd.f32 1.0, %v3045_v36 }
 0xc0b   :  { %v3049_v43 = vpop.eup %3048  ;;  %3058 = vrcp.f32 %v1524_v63  ;;  %v1525_v44 = vadd.f32 1.0, %v3047_v41 }
 0xc0c   :  { %3060 = vrcp.f32 %v1522_v42  ;;  %v1523_v45 = vadd.f32 1.0, %v3049_v43  ;;  %v2981_v43 = vld [vmem:[%s3917_s3 + $0x58] sm:$0xff]  }
 0xc0d   :  { %v3051_v46 = vpop.eup %3050  ;;  %3062 = vrcp.f32 %v1525_v44  ;;  %2779 = vmatprep.subr.bf16.mxu0 %v2981_v43  ;;  %v2601_v44 = vld [vmem:[%s3918_s4 + $0xa] ss:$0 sm:$0xff] }
 0xc0e   :  { %v3053_v47 = vpop.eup %3052  ;;  %v1267_v50 = vmul.f32 %v3051_v46, %v3506_v53  ;;  %3064 = vrcp.f32 %v1523_v45  ;;  %2780 = vmatpush3.bf16.msra.mxu0 %v2981_v43 }
 0xc0f   :  { %v3055_v51 = vpop.eup %3054  ;;  %v1265_v57 = vmul.f32 %v3053_v47, %v3512_v55 }
 0xc10   :  { %v3057_v58 = vpop.eup %3056  ;;  %v1268_v59 = vmul.f32 %v3055_v51, %v3509_v54  ;;  %v1278_v61 = vsel %vm111_vm1, %v1267_v50, 0.0 }
 0xc11   :  { %v1266_v60 = vmul.f32 %v3057_v58, %v3515_v56  ;;  %v1269_v1 = vsel %vm111_vm1, %v1265_v57, 0.0 }
 0xc12   :  { %v1279_v62 = vsel %vm111_vm1, %v1268_v59, 0.0 }
 0xc13   :  { %v3595_v3 = vadd.f32 %v1279_v62, %v1278_v61  ;;  %v1270_v30 = vsel %vm111_vm1, %v1266_v60, 0.0 }
 0xc14   :  { %v3598_v25 = vadd.f32 %v1270_v30, %v1269_v1 }
 0xc15   :  { %v3059_v4 = vpop.eup %3058 }
 0xc16   :  { %v3061_v5 = vpop.eup %3060  ;;  %v3601_v8 = vmul.f32 %v3059_v4, %v3240_v18 }
 0xc17   :  { %v3063_v6 = vpop.eup %3062  ;;  %v3607_v10 = vmul.f32 %v3061_v5, %v3232_v14 }
 0xc18   :  { %v3065_v7 = vpop.eup %3064  ;;  %v3604_v9 = vmul.f32 %v3063_v6, %v3236_v16 }
 0xc19   :  { %v3610_v11 = vmul.f32 %v3065_v7, %v3234_v15  ;;  %v1560_v18 = vrot.slane %v3607_v10, 2  ;;  %v1562_v15 = vrot.slane %v3601_v8, 2 }
 0xc1a   :  { %v2915_v48 = vpack.i.bf16 %v3604_v9, %v3601_v8  ;;  %v1563_v16 = vrot.slane %v3604_v9, 2 }
 0xc1b   :  { %v2910_v49 = vpack.i.bf16 %v3610_v11, %v3607_v10  ;;  %v1561_v14 = vrot.slane %v3610_v11, 2 }
 0xc1c   :  { %2916 = vrot.lane.b32.xlu1 %v2915_v48, %s3157_s0  ;;  %v1568_v52 = vsel %vm1564_vm15, %v1563_v16, %v1560_v18  ;;  %v1565_v20 = vsel %vm1564_vm15, %v1562_v15, %v1563_v16 }
 0xc1d   :  { %2911 = vrot.lane.b32.xlu0 %v2910_v49, %s3157_s0  ;;  %v1566_v2 = vsel %vm1564_vm15, %v1561_v14, %v1562_v15  ;;  %v1584_v22 = vsel %vm1572_vm0, %v1568_v52, 0.0  ;;  %v1567_v35 = vsel %vm1564_vm15, %v1560_v18, %v1561_v14 }
 0xc1e   :  { %v1582_v28 = vsel %vm1570_vm2, %v1566_v2, 0.0 }
 0xc8e   :  { %v2917_v0 = vpop.permute.xlu1 %2916 }
 0xc8f   :  { %v2919_v12 = vunpack.i.h.bf16 %v2917_v0  ;;  %v2918_v17 = vunpack.i.l.bf16 %v2917_v0  ;;  %v2912_v13 = vpop.permute.xlu0 %2911 }
 0xc90   :  { %v2914_v19 = vunpack.i.h.bf16 %v2912_v13  ;;  %v2913_v23 = vunpack.i.l.bf16 %v2912_v13 }
 0xc91   :  { %v1603_v24 = vsel %vm111_vm1, %v1565_v20, %v2918_v17  ;;  %v1604_v27 = vsel %vm111_vm1, %v1584_v22, %v2919_v12 }
 0xc92   :  { %v1602_v36 = vsel %vm111_vm1, %v1582_v28, %v2914_v19  ;;  %v1601_v63 = vsel %vm111_vm1, %v1567_v35, %v2913_v23  ;;  %v1606_v42 = vpack.c.bf16 %v1604_v27, %v1603_v24  ;;  %v2982_v35 = vld [vmem:[%s3917_s3 + $0x60] sm:$0xff]  }
 0xc93   :  { %v1605_v41 = vpack.c.bf16 %v1602_v36, %v1601_v63  ;;  %2785 = vmatprep.subr.bf16.mxu1 %v2982_v35  ;;  %v2608_v36 = vld [vmem:[%s3918_s4 + $0xb] ss:$0 sm:$0xff] }
 0xc95   :  { %2775 = vmatprep.mubr.msk.bf16.mxu1 %vm233_vm8, %v1605_v41 }
 0xc96   :  { %2776 = vmatmul.mubr.msk.bf16.vlgmr.msra.gmra.mrb[20].mxu1 %vm233_vm8, %v1606_v42 }
 0xc97   :  { %2786 = vmatpush3.bf16.msra.mxu1 %v2982_v35 }
 0xc98   :  { %2797 = vmatprep.subr.bf16.mxu1 %v2984_v31 }
 0xd69   :  { %v2777_v45 = vpop.f32.mrb[20].mxu1 }
 0xd6a   :  { %v1673_v46 = vadd.f32 %v2777_v45, %v2601_v44  ;;  %v1664_v47 = vpop.f32.mrb[21].mxu1 }
 0xd6b   :  { %v1665_v50 = vadd.f32 %v2601_v44, %v1664_v47  ;;  %v2778_v51 = vpop.f32.mrb[22].mxu1 }
 0xd6c   :  { %v1681_v57 = vmax.f32 %v1673_v46, 0.0  ;;  %v1676_v58 = vadd.f32 %v2778_v51, %v2601_v44  ;;  %v1667_v59 = vpop.f32.mrb[23].mxu1 }
 0xd6d   :  { %v1679_v60 = vmax.f32 %v1665_v50, 0.0  ;;  %v1668_v61 = vadd.f32 %v2601_v44, %v1667_v59 }
 0xd6e   :  { %v1682_v62 = vmax.f32 %v1676_v58, 0.0  ;;  %v1685_v4 = vrot.slane %v1681_v57, 2 }
 0xd6f   :  { %v1683_v1 = vrot.slane %v1679_v60, 2  ;;  %v1680_v30 = vmax.f32 %v1668_v61, 0.0 }
 0xd70   :  { %v2925_v5 = vpack.i.bf16 %v1682_v62, %v1681_v57  ;;  %v1686_v6 = vrot.slane %v1682_v62, 2 }
 0xd71   :  { %v1684_v7 = vrot.slane %v1680_v30, 2  ;;  %v2920_v48 = vpack.i.bf16 %v1680_v30, %v1679_v60 }
 0xd72   :  { %v1687_v49 = vsel %vm1564_vm15, %v1685_v4, %v1686_v6  ;;  %v1690_v18 = vsel %vm1564_vm15, %v1686_v6, %v1683_v1  ;;  %2926 = vrot.lane.b32.xlu1 %v2925_v5, %s3157_s0 }
 0xd73   :  { %v1688_v16 = vsel %vm1564_vm15, %v1684_v7, %v1685_v4  ;;  %v1689_v14 = vsel %vm1564_vm15, %v1683_v1, %v1684_v7  ;;  %2921 = vrot.lane.b32.xlu0 %v2920_v48, %s3157_s0  ;;  %v1694_v12 = vsel %vm1572_vm0, %v1690_v18, 0.0 }
 0xd74   :  { %v1692_v19 = vsel %vm1570_vm2, %v1688_v16, 0.0 }
 0xde4   :  { %v2927_v15 = vpop.permute.xlu1 %2926 }
 0xde5   :  { %v2929_v52 = vunpack.i.h.bf16 %v2927_v15  ;;  %v2928_v0 = vunpack.i.l.bf16 %v2927_v15  ;;  %v2922_v2 = vpop.permute.xlu0 %2921 }
 0xde6   :  { %v2924_v17 = vunpack.i.h.bf16 %v2922_v2  ;;  %v2923_v13 = vunpack.i.l.bf16 %v2922_v2 }
 0xde7   :  { %v1713_v20 = vsel %vm111_vm1, %v1687_v49, %v2928_v0  ;;  %v1714_v22 = vsel %vm111_vm1, %v1694_v12, %v2929_v52 }
 0xde8   :  { %v1716_v23 = vpack.c.bf16 %v1714_v22, %v1713_v20  ;;  %v1712_v24 = vsel %vm111_vm1, %v1692_v19, %v2924_v17  ;;  %v1711_v27 = vsel %vm111_vm1, %v1689_v14, %v2923_v13 }
 0xde9   :  { %v1715_v28 = vpack.c.bf16 %v1712_v24, %v1711_v27 }
 0xdeb   :  { %2781 = vmatprep.mubr.msk.bf16.mxu0 %vm233_vm8, %v1715_v28 }
 0xdec   :  { %2782 = vmatmul.mubr.msk.bf16.vlgmr.msra.gmra.mrb[24].mxu0 %vm233_vm8, %v1716_v23 }
 0xebf   :  { %v2783_v63 = vpop.f32.mrb[24].mxu0 }
 0xec0   :  { %v1783_v41 = vadd.f32 %v2783_v63, %v2608_v36  ;;  %v1774_v42 = vpop.f32.mrb[25].mxu0 }
 0xec1   :  { %v1775_v43 = vadd.f32 %v2608_v36, %v1774_v42  ;;  %v2784_v44 = vpop.f32.mrb[26].mxu0 }
 0xec2   :  { %v1791_v45 = vmax.f32 %v1783_v41, 0.0  ;;  %v1786_v46 = vadd.f32 %v2784_v44, %v2608_v36  ;;  %v1777_v47 = vpop.f32.mrb[27].mxu0 }
 0xec3   :  { %v1789_v50 = vmax.f32 %v1775_v43, 0.0  ;;  %v1778_v51 = vadd.f32 %v2608_v36, %v1777_v47 }
 0xec4   :  { %v2614_v57 = vmul.f32 -1.442695, %v1791_v45  ;;  %v1792_v58 = vmax.f32 %v1786_v46, 0.0 }
 0xec5   :  { %v2612_v59 = vmul.f32 -1.442695, %v1789_v50  ;;  %v1790_v60 = vmax.f32 %v1778_v51, 0.0 }
 0xec6   :  { %3066 = vpow2.f32 %v2614_v57  ;;  %v2615_v61 = vmul.f32 -1.442695, %v1792_v58 }
 0xec7   :  { %3068 = vpow2.f32 %v2612_v59  ;;  %v2613_v62 = vmul.f32 -1.442695, %v1790_v60  ;;  %v2983_v60 = vld [vmem:[%s3917_s3 + $0x68] sm:$0xff]  }
 0xec8   :  { %3070 = vpow2.f32 %v2615_v61  ;;  %2791 = vmatprep.subr.bf16.mxu0 %v2983_v60  ;;  %v2619_v61 = vld [vmem:[%s3918_s4 + $0xc] ss:$0 sm:$0xff] }
 0xec9   :  { %3072 = vpow2.f32 %v2613_v62  ;;  %2792 = vmatpush3.bf16.msra.mxu0 %v2983_v60 }
 0xed0   :  { %v3067_v1 = vpop.eup %3066 }
 0xed1   :  { %v3069_v30 = vpop.eup %3068  ;;  %v1807_v4 = vadd.f32 1.0, %v3067_v1 }
 0xed2   :  { %v3071_v5 = vpop.eup %3070  ;;  %v1805_v6 = vadd.f32 1.0, %v3069_v30 }
 0xed3   :  { %v3073_v7 = vpop.eup %3072  ;;  %3074 = vrcp.f32 %v1807_v4  ;;  %v1808_v48 = vadd.f32 1.0, %v3071_v5 }
 0xed4   :  { %3076 = vrcp.f32 %v1805_v6  ;;  %v1806_v49 = vadd.f32 1.0, %v3073_v7 }
 0xed5   :  { %3078 = vrcp.f32 %v1808_v48 }
 0xed6   :  { %3080 = vrcp.f32 %v1806_v49 }
 0xedd   :  { %v3075_v18 = vpop.eup %3074 }
 0xede   :  { %v3077_v16 = vpop.eup %3076  ;;  %v3676_v52 = vmul.f32 %v3075_v18, %v3601_v8 }
 0xedf   :  { %v3079_v14 = vpop.eup %3078  ;;  %v3682_v2 = vmul.f32 %v3077_v16, %v3607_v10 }
 0xee0   :  { %v3081_v15 = vpop.eup %3080  ;;  %v3679_v0 = vmul.f32 %v3079_v14, %v3604_v9  ;;  %v1845_v23 = vrot.slane %v3676_v52, 4 }
 0xee1   :  { %v3685_v12 = vmul.f32 %v3081_v15, %v3610_v11  ;;  %v1843_v20 = vrot.slane %v3682_v2, 4 }
 0xee2   :  { %v2935_v17 = vpack.i.bf16 %v3679_v0, %v3676_v52  ;;  %v1846_v22 = vrot.slane %v3679_v0, 4 }
 0xee3   :  { %v2930_v13 = vpack.i.bf16 %v3685_v12, %v3682_v2  ;;  %v1844_v19 = vrot.slane %v3685_v12, 4 }
 0xee4   :  { %2936 = vrot.lane.b32.xlu1 %v2935_v17, %s3157_s0  ;;  %v1850_v24 = vsel %vm744_vm12, %v1846_v22, %v1843_v20  ;;  %v1847_v41 = vsel %vm744_vm12, %v1845_v23, %v1846_v22 }
 0xee5   :  { %2931 = vrot.lane.b32.xlu0 %v2930_v13, %s3157_s0  ;;  %v1848_v28 = vsel %vm744_vm12, %v1844_v19, %v1845_v23  ;;  %v1866_v42 = vsel %vm1854_vm3, %v1850_v24, 0.0  ;;  %v1849_v50 = vsel %vm744_vm12, %v1843_v20, %v1844_v19 }
 0xee6   :  { %v1864_v47 = vsel %vm1852_vm4, %v1848_v28, 0.0 }
 0xf56   :  { %v2937_v27 = vpop.permute.xlu1 %2936 }
 0xf57   :  { %v2939_v35 = vunpack.i.h.bf16 %v2937_v27  ;;  %v2938_v36 = vunpack.i.l.bf16 %v2937_v27  ;;  %v2932_v63 = vpop.permute.xlu0 %2931 }
 0xf58   :  { %v2934_v43 = vunpack.i.h.bf16 %v2932_v63  ;;  %v2933_v44 = vunpack.i.l.bf16 %v2932_v63 }
 0xf59   :  { %v1885_v45 = vsel %vm111_vm1, %v1847_v41, %v2938_v36  ;;  %v1886_v46 = vsel %vm111_vm1, %v1866_v42, %v2939_v35 }
 0xf5a   :  { %v1884_v51 = vsel %vm111_vm1, %v1864_v47, %v2934_v43  ;;  %v1883_v57 = vsel %vm111_vm1, %v1849_v50, %v2933_v44  ;;  %v1888_v59 = vpack.c.bf16 %v1886_v46, %v1885_v45 }
 0xf5b   :  { %v1887_v58 = vpack.c.bf16 %v1884_v51, %v1883_v57 }
 0xf5d   :  { %2787 = vmatprep.mubr.msk.bf16.mxu1 %vm233_vm8, %v1887_v58 }
 0xf5e   :  { %2788 = vmatmul.mubr.msk.bf16.vlgmr.msra.gmra.mrb[24].mxu1 %vm233_vm8, %v1888_v59 }
 0xf5f   :  { %2798 = vmatpush3.bf16.msra.mxu1 %v2984_v31 }
0x1031   :  { %v2789_v62 = vpop.f32.mrb[24].mxu1 }
0x1032   :  { %v1955_v1 = vadd.f32 %v2789_v62, %v2619_v61  ;;  %v1946_v30 = vpop.f32.mrb[25].mxu1 }
0x1033   :  { %v1947_v4 = vadd.f32 %v2619_v61, %v1946_v30  ;;  %v2790_v5 = vpop.f32.mrb[26].mxu1 }
0x1034   :  { %v1963_v6 = vmax.f32 %v1955_v1, 0.0  ;;  %v1958_v7 = vadd.f32 %v2790_v5, %v2619_v61  ;;  %v1949_v48 = vpop.f32.mrb[27].mxu1 }
0x1035   :  { %v1961_v49 = vmax.f32 %v1947_v4, 0.0  ;;  %v1950_v18 = vadd.f32 %v2619_v61, %v1949_v48 }
0x1036   :  { %v1964_v16 = vmax.f32 %v1958_v7, 0.0  ;;  %v1967_v17 = vrot.slane %v1963_v6, 4 }
0x1037   :  { %v1965_v14 = vrot.slane %v1961_v49, 4  ;;  %v1962_v15 = vmax.f32 %v1950_v18, 0.0 }
0x1038   :  { %v2945_v13 = vpack.i.bf16 %v1964_v16, %v1963_v6  ;;  %v1968_v20 = vrot.slane %v1964_v16, 4 }
0x1039   :  { %v1966_v22 = vrot.slane %v1962_v15, 4  ;;  %v2940_v19 = vpack.i.bf16 %v1962_v15, %v1961_v49 }
0x103a   :  { %v1969_v23 = vsel %vm744_vm12, %v1967_v17, %v1968_v20  ;;  %v1972_v24 = vsel %vm744_vm12, %v1968_v20, %v1965_v14  ;;  %2946 = vrot.lane.b32.xlu1 %v2945_v13, %s3157_s0 }
0x103b   :  { %v1970_v27 = vsel %vm744_vm12, %v1966_v22, %v1967_v17  ;;  %v1971_v28 = vsel %vm744_vm12, %v1965_v14, %v1966_v22  ;;  %2941 = vrot.lane.b32.xlu0 %v2940_v19, %s3157_s0  ;;  %v1976_v42 = vsel %vm1854_vm3, %v1972_v24, 0.0 }
0x103c   :  { %v1974_v47 = vsel %vm1852_vm4, %v1970_v27, 0.0 }
0x10ac   :  { %v2947_v35 = vpop.permute.xlu1 %2946 }
0x10ad   :  { %v2949_v36 = vunpack.i.h.bf16 %v2947_v35  ;;  %v2948_v63 = vunpack.i.l.bf16 %v2947_v35  ;;  %v2942_v41 = vpop.permute.xlu0 %2941 }
0x10ae   :  { %v2944_v43 = vunpack.i.h.bf16 %v2942_v41  ;;  %v2943_v44 = vunpack.i.l.bf16 %v2942_v41 }
0x10af   :  { %v1995_v45 = vsel %vm111_vm1, %v1969_v23, %v2948_v63  ;;  %v1996_v46 = vsel %vm111_vm1, %v1976_v42, %v2949_v36 }
0x10b0   :  { %v1998_v21 = vpack.c.bf16 %v1996_v46, %v1995_v45  ;;  %v1994_v50 = vsel %vm111_vm1, %v1974_v47, %v2944_v43  ;;  %v1993_v51 = vsel %vm111_vm1, %v1971_v28, %v2943_v44 }
0x10b1   :  { %v1997_v57 = vpack.c.bf16 %v1994_v50, %v1993_v51 }
0x10b3   :  { %2793 = vmatprep.mubr.msk.bf16.mxu0 %vm233_vm8, %v1997_v57 }
0x10b4   :  { %2794 = vmatmul.mubr.msk.bf16.vlgmr.msra.gmra.mrb[28].mxu0 %vm233_vm8, %v1998_v21 }
0x1187   :  { %v2795_v58 = vpop.f32.mrb[28].mxu0 }
0x1188   :  { %v2065_v59 = vadd.f32 %v2795_v58, %v2626_v26  ;;  %v2056_v60 = vpop.f32.mrb[29].mxu0 }
0x1189   :  { %v2057_v61 = vadd.f32 %v2626_v26, %v2056_v60  ;;  %v2796_v62 = vpop.f32.mrb[30].mxu0 }
0x118a   :  { %v2073_v1 = vmax.f32 %v2065_v59, 0.0  ;;  %v2068_v30 = vadd.f32 %v2796_v62, %v2626_v26  ;;  %v2059_v4 = vpop.f32.mrb[31].mxu0  ;;  %v2985_v62 = vld [vmem:[%s3917_s3 + $0x78] sm:$0xff]  }
0x118b   :  { %v2071_v5 = vmax.f32 %v2057_v61, 0.0  ;;  %v2060_v6 = vadd.f32 %v2626_v26, %v2059_v4  ;;  %2803 = vmatprep.subr.bf16.mxu0 %v2985_v62 }
0x118c   :  { %v2632_v7 = vmul.f32 -1.442695, %v2073_v1  ;;  %v2074_v48 = vmax.f32 %v2068_v30, 0.0  ;;  %2804 = vmatpush3.bf16.msra.mxu0 %v2985_v62  ;;  %v2637_v1 = vld [vmem:[%s3918_s4 + $0xe] ss:$0 sm:$0xff]  ;;  %v725_v62 = vsel %vm111_vm1, %v3428_v37, 0.0 }
0x118d   :  { %v2630_v49 = vmul.f32 -1.442695, %v2071_v5  ;;  %v2072_v18 = vmax.f32 %v2060_v6, 0.0 }
0x118e   :  { %3082 = vpow2.f32 %v2632_v7  ;;  %v2633_v16 = vmul.f32 -1.442695, %v2074_v48 }
0x118f   :  { %3084 = vpow2.f32 %v2630_v49  ;;  %v2631_v14 = vmul.f32 -1.442695, %v2072_v18 }
0x1190   :  { %3086 = vpow2.f32 %v2633_v16 }
0x1191   :  { %3088 = vpow2.f32 %v2631_v14 }
0x1198   :  { %v3083_v15 = vpop.eup %3082 }
0x1199   :  { %v3085_v17 = vpop.eup %3084  ;;  %v2089_v13 = vadd.f32 1.0, %v3083_v15 }
0x119a   :  { %v3087_v20 = vpop.eup %3086  ;;  %v2087_v22 = vadd.f32 1.0, %v3085_v17 }
0x119b   :  { %v3089_v19 = vpop.eup %3088  ;;  %3090 = vrcp.f32 %v2089_v13  ;;  %v2090_v23 = vadd.f32 1.0, %v3087_v20 }
0x119c   :  { %3092 = vrcp.f32 %v2087_v22  ;;  %v2088_v24 = vadd.f32 1.0, %v3089_v19 }
0x119d   :  { %3094 = vrcp.f32 %v2090_v23 }
0x119e   :  { %3096 = vrcp.f32 %v2088_v24 }
0x11a5   :  { %v3091_v27 = vpop.eup %3090 }
0x11a6   :  { %v3093_v28 = vpop.eup %3092  ;;  %v3750_v63 = vmul.f32 %v3091_v27, %v3676_v52 }
0x11a7   :  { %v3095_v35 = vpop.eup %3094  ;;  %v3756_v42 = vmul.f32 %v3093_v28, %v3682_v2 }
0x11a8   :  { %v3097_v36 = vpop.eup %3096  ;;  %v3753_v41 = vmul.f32 %v3095_v35, %v3679_v0 }
0x11a9   :  { %v3759_v43 = vmul.f32 %v3097_v36, %v3685_v12 }
0x11aa   :  { %v2955_v44 = vpack.i.bf16 %v3753_v41, %v3750_v63 }
0x11ab   :  { %v2950_v45 = vpack.i.bf16 %v3759_v43, %v3756_v42 }
0x11ac   :  { %2956 = vrot.lane.b32.xlu1 %v2955_v44, %s3157_s0 }
0x11ad   :  { %2951 = vrot.lane.b32.xlu0 %v2950_v45, %s3157_s0 }
0x121e   :  { %v2957_v46 = vpop.permute.xlu1 %2956 }
0x121f   :  { %v2959_v47 = vunpack.i.h.bf16 %v2957_v46  ;;  %v2958_v21 = vunpack.i.l.bf16 %v2957_v46  ;;  %v2952_v50 = vpop.permute.xlu0 %2951 }
0x1220   :  { %v2954_v51 = vunpack.i.h.bf16 %v2952_v50  ;;  %v2953_v57 = vunpack.i.l.bf16 %v2952_v50  ;;  %v3158_v50 = vmov 0.0  }
0x1221   :  { %v2160_v31 = vsel %vm111_vm1, 0.0, %v2959_v47  ;;  %v2159_v26 = vsel %vm111_vm1, %v3753_v41, %v2958_v21  ;;  %v2391_v21 = vld [vmem:[%s3919_s5] sm:$0xff]  ;;  %2809 = vmatprep.subr.mxu1 %v3158_v50 }
0x1222   :  { %v2158_v58 = vsel %vm111_vm1, 0.0, %v2954_v51  ;;  %v2157_v59 = vsel %vm111_vm1, %v3759_v43, %v2953_v57  ;;  %v2162_v61 = vpack.c.bf16 %v2160_v31, %v2159_v26  ;;  %v441_v51 = vsel %vm111_vm1, %v3356_v32, 0.0 }
0x1223   :  { %v2161_v60 = vpack.c.bf16 %v2158_v58, %v2157_v59  ;;  %v440_v57 = vsel %vm111_vm1, %v3353_v29, 0.0  ;;  %v432_v26 = vsel %vm111_vm1, %v3362_v34, 0.0  ;;  %v431_v58 = vsel %vm111_vm1, %v3359_v33, 0.0  ;;  %v2644_v33 = vld [vmem:[%s3918_s4 + $0xf] ss:$0 sm:$0xff]  ;;  %s3851_s4 = sld [smem:[#allocation2]] }
0x1224   :  { %v442_v31 = vadd.f32 %v441_v51, %v440_v57  ;;  %v433_v59 = vadd.f32 %v432_v26, %v431_v58  ;;  %v717_v32 = vsel %vm111_vm1, %v3437_v40, 0.0  ;;  %v716_v34 = vsel %vm111_vm1, %v3434_v39, 0.0 }
0x1225   :  { %2799 = vmatprep.mubr.msk.bf16.mxu1 %vm233_vm8, %v2161_v60  ;;  %v726_v60 = vsel %vm111_vm1, %v3431_v38, 0.0 }
0x1226   :  { %2800 = vmatmul.mubr.msk.bf16.vlgmr.msra.gmra.mrb[28].mxu1 %vm233_vm8, %v2162_v61  ;;  %v443_v61 = vrot.slane %v442_v31, 4  ;;  %v434_v29 = vrot.slane %v433_v59, 4 }
0x1227   :  { %2811 = vmatprep.mubr.msk.f32.mxu1 %vm3159_vm5, %v3158_v50  ;;  %2810 = vmatpush3.msra.mxu1 %v2391_v21 }
0x1228   :  { %v435_v38 = vadd.f32 %v434_v29, %v433_v59  ;;  %v1539_v59 = vsel %vm111_vm1, %v3610_v11, 0.0  ;;  %v1538_v29 = vsel %vm111_vm1, %v3607_v10, 0.0 }
0x12f9   :  { %v2801_v30 = vpop.f32.mrb[28].mxu1 }
0x12fa   :  { %v2229_v4 = vadd.f32 %v2801_v30, %v2637_v1  ;;  %v2220_v5 = vpop.f32.mrb[29].mxu1  ;;  %v444_v30 = vadd.f32 %v443_v61, %v442_v31  ;;  %v1281_v61 = vrot.slane %v3595_v3, 4 }
0x12fb   :  { %v2221_v6 = vadd.f32 %v2637_v1, %v2220_v5  ;;  %v2802_v7 = vpop.f32.mrb[30].mxu1 }
0x12fc   :  { %v2232_v48 = vadd.f32 %v2802_v7, %v2637_v1  ;;  %v2223_v49 = vpop.f32.mrb[31].mxu1  ;;  %v2237_v16 = vmax.f32 %v2229_v4, 0.0  ;;  %v718_v4 = vadd.f32 %v717_v32, %v716_v34  ;;  %v1540_v34 = vadd.f32 %v1539_v59, %v1538_v29 }
0x12fd   :  { %v2224_v18 = vadd.f32 %v2637_v1, %v2223_v49  ;;  %v2235_v15 = vmax.f32 %v2221_v6, 0.0  ;;  %v727_v1 = vadd.f32 %v726_v60, %v725_v62  ;;  %v445_v6 = vrot.slane %v444_v30, 2 }
0x12fe   :  { %v2238_v14 = vmax.f32 %v2232_v48, 0.0  ;;  %v719_v48 = vrot.slane %v718_v4, 4  ;;  %v1547_v62 = vsel %vm111_vm1, %v3601_v8, 0.0  ;;  %v2113_v8 = vsel %vm111_vm1, %v3753_v41, 0.0 }
0x12ff   :  { %v2236_v17 = vmax.f32 %v2224_v18, 0.0  ;;  %v728_v5 = vrot.slane %v727_v1, 4  ;;  %v3811_v39 = vadd.f32 %v445_v6, %v444_v30  ;;  %v1822_v30 = vsel %vm111_vm1, %v3685_v12, 0.0 }
0x1300   :  { %v2965_v13 = vpack.i.bf16 %v2238_v14, %v2237_v16  ;;  %v1282_v12 = vadd.f32 %v1281_v61, %v3595_v3  ;;  %v1272_v6 = vrot.slane %v3598_v25, 4 }
0x1301   :  { %v2960_v20 = vpack.i.bf16 %v2236_v17, %v2235_v15  ;;  %v729_v18 = vadd.f32 %v728_v5, %v727_v1  ;;  %v447_v26 = vrot.slane %v3811_v39, 1  ;;  %v1831_v1 = vsel %vm111_vm1, %v3679_v0, 0.0 }
0x1302   :  { %2966 = vrot.lane.b32.xlu1 %v2965_v13, %s3157_s0  ;;  %v1821_v0 = vsel %vm111_vm1, %v3682_v2, 0.0  ;;  %v2103_v2 = vsel %vm111_vm1, %v3756_v42, 0.0 }
0x1303   :  { %2961 = vrot.lane.b32.xlu0 %v2960_v20, %s3157_s0  ;;  %v1011_v20 = vsel %vm111_vm1, %v3509_v54, 0.0 }
0x1374   :  { %v2967_v22 = vpop.permute.xlu1 %2966 }
0x1375   :  { %v2969_v19 = vunpack.i.h.bf16 %v2967_v22  ;;  %v2968_v23 = vunpack.i.l.bf16 %v2967_v22  ;;  %v2962_v24 = vpop.permute.xlu0 %2961 }
0x1376   :  { %v2964_v27 = vunpack.i.h.bf16 %v2962_v24  ;;  %v2963_v28 = vunpack.i.l.bf16 %v2962_v24  ;;  %v1002_v24 = vsel %vm111_vm1, %v3515_v56, 0.0 }
0x1377   :  { %v2262_v35 = vsel %vm111_vm1, 0.0, %v2969_v19  ;;  %v2261_v36 = vsel %vm111_vm1, %v2238_v14, %v2968_v23  ;;  %v436_v14 = vrot.slane %v435_v38, 2  ;;  %v720_v23 = vadd.f32 %v719_v48, %v718_v4 }
0x1378   :  { %v2260_v44 = vsel %vm111_vm1, 0.0, %v2964_v27  ;;  %v2259_v45 = vsel %vm111_vm1, %v2236_v17, %v2963_v28  ;;  %v2264_v47 = vpack.c.bf16 %v2262_v35, %v2261_v36  ;;  %v730_v35 = vrot.slane %v729_v18, 2 }
0x1379   :  { %v2263_v46 = vpack.c.bf16 %v2260_v44, %v2259_v45  ;;  %v1010_v36 = vsel %vm111_vm1, %v3506_v53, 0.0  ;;  %v3821_v21 = vadd.f32 %v436_v14, %v435_v38  ;;  %v721_v56 = vrot.slane %v720_v23, 2 }
0x137a   :  { %v3823_v57 = vadd.f32 %v730_v35, %v729_v18  ;;  %v1548_v53 = vsel %vm111_vm1, %v3604_v9, 0.0  ;;  %v1830_v4 = vsel %vm111_vm1, %v3676_v52, 0.0  ;;  %v2104_v38 = vsel %vm111_vm1, %v3759_v43, 0.0 }
0x137b   :  { %2805 = vmatprep.mubr.msk.bf16.mxu0 %vm233_vm8, %v2263_v46  ;;  %v1012_v46 = vadd.f32 %v1011_v20, %v1010_v36  ;;  %v3831_v60 = vadd.f32 %v721_v56, %v720_v23  ;;  %v1549_v32 = vadd.f32 %v1548_v53, %v1547_v62  ;;  %v2112_v52 = vsel %vm111_vm1, %v3750_v63, 0.0 }
0x137c   :  { %2806 = vmatmul.mubr.msk.bf16.vlgmr.msra.gmra.mrb[32].mxu0 %vm233_vm8, %v2264_v47  ;;  %v1001_v47 = vsel %vm111_vm1, %v3512_v55, 0.0  ;;  %v438_v55 = vrot.slane %v3821_v21, 1  ;;  %v732_v9 = vrot.slane %v3823_v57, 1  ;;  %v1541_v14 = vrot.slane %v1540_v34, 4 }
0x137d   :  { %v1003_v50 = vadd.f32 %v1002_v24, %v1001_v47  ;;  %v1013_v31 = vrot.slane %v1012_v46, 4  ;;  %v723_v36 = vrot.slane %v3831_v60, 1  ;;  %v448_v47 = vadd.f32 %v447_v26, %v3811_v39 }
0x137e   :  { %v439_v56 = vadd.f32 %v438_v55, %v3821_v21  ;;  %v733_v59 = vadd.f32 %v732_v9, %v3823_v57 }
0x137f   :  { %v1004_v58 = vrot.slane %v1003_v50, 4  ;;  %v1014_v11 = vadd.f32 %v1013_v31, %v1012_v46 }
0x1381   :  { %v1005_v5 = vadd.f32 %v1004_v58, %v1003_v50 }
0x144f   :  { %v2807_v7 = vpop.f32.mrb[32].mxu0 }
0x1450   :  { %v2331_v37 = vadd.f32 %v2807_v7, %v2644_v33  ;;  %v2322_v49 = vpop.f32.mrb[33].mxu0  ;;  %v1823_v7 = vadd.f32 %v1822_v30, %v1821_v0 }
0x1451   :  { %v2323_v16 = vadd.f32 %v2644_v33, %v2322_v49  ;;  %v2808_v40 = vpop.f32.mrb[34].mxu0  ;;  %v2114_v49 = vadd.f32 %v2113_v8, %v2112_v52  ;;  %v1020_v52 = vstv %s3867_s11 }
0x1452   :  { %v2339_v15 = vmax.f32 %v2331_v37, 0.0  ;;  %v2334_v17 = vadd.f32 %v2808_v40, %v2644_v33  ;;  %v2325_v13 = vpop.f32.mrb[35].mxu0  ;;  %v1550_v37 = vrot.slane %v1549_v32, 4  ;;  %v1015_v40 = vrot.slane %v1014_v11, 2 }
0x1453   :  { %v2337_v22 = vmax.f32 %v2323_v16, 0.0  ;;  %v2326_v19 = vadd.f32 %v2644_v33, %v2325_v13  ;;  %v1832_v33 = vadd.f32 %v1831_v1, %v1830_v4  ;;  %v1006_v13 = vrot.slane %v1005_v5, 2 }
0x1454   :  { %v2650_v27 = vmul.f32 -1.442695, %v2339_v15  ;;  %v2340_v28 = vmax.f32 %v2334_v17, 0.0  ;;  %v2105_v15 = vadd.f32 %v2104_v38, %v2103_v2  ;;  %v1824_v23 = vrot.slane %v1823_v7, 4 }
0x1455   :  { %v2648_v44 = vmul.f32 -1.442695, %v2337_v22  ;;  %v2338_v45 = vmax.f32 %v2326_v19, 0.0  ;;  %v1833_v20 = vrot.slane %v1832_v33, 4  ;;  %v1273_v19 = vadd.f32 %v1272_v6, %v3598_v25 }
0x1456   :  { %3098 = vpow2.f32 %v2650_v27  ;;  %v2651_v54 = vmul.f32 -1.442695, %v2340_v28  ;;  %v1283_v27 = vrot.slane %v1282_v12, 2  ;;  %v1551_v28 = vadd.f32 %v1550_v37, %v1549_v32 }
0x1457   :  { %3100 = vpow2.f32 %v2648_v44  ;;  %v2649_v51 = vmul.f32 -1.442695, %v2338_v45  ;;  %v2115_v35 = vrot.slane %v2114_v49, 4  ;;  %v1542_v44 = vadd.f32 %v1541_v14, %v1540_v34 }
0x1458   :  { %3102 = vpow2.f32 %v2651_v54  ;;  %v2106_v45 = vrot.slane %v2105_v15, 4  ;;  %v1016_v46 = vadd.f32 %v1015_v40, %v1014_v11  ;;  %v3865_v54 = vstv %s3851_s4 }
0x1459   :  { %3104 = vpow2.f32 %v2649_v51  ;;  %v1834_v25 = vadd.f32 %v1833_v20, %v1832_v33  ;;  %v1007_v50 = vadd.f32 %v1006_v13, %v1005_v5  ;;  %v1274_v51 = vrot.slane %v1273_v19, 2 }
0x145a   :  { %v1825_v31 = vadd.f32 %v1824_v23, %v1823_v7  ;;  %v1284_v53 = vadd.f32 %v1283_v27, %v1282_v12  ;;  %v2116_v58 = vadd.f32 %v2115_v35, %v2114_v49  ;;  %v1552_v61 = vrot.slane %v1551_v28, 2 }
0x145b   :  { %v2107_v62 = vadd.f32 %v2106_v45, %v2105_v15  ;;  %v724_v1 = vadd.f32 %v723_v36, %v3831_v60  ;;  %v3873_v32 = vstv %s3859_s10  ;;  %v1543_v39 = vrot.slane %v1542_v44, 2 }
0x145c   :  { %v1017_v26 = vrot.slane %v1016_v46, 1  ;;  %v452_v29 = vmul.f32 %v3865_v54, %v448_v47  ;;  %v1835_v30 = vrot.slane %v1834_v25, 2  ;;  %v1008_v11 = vrot.slane %v1007_v50, 1 }
0x145d   :  { %v1275_v34 = vadd.f32 %v1274_v51, %v1273_v19  ;;  %v451_v21 = vmul.f32 %v3865_v54, %v439_v56  ;;  %v1826_v55 = vrot.slane %v1825_v31, 2  ;;  %v2117_v9 = vrot.slane %v2116_v58, 2 }
0x145e   :  { %v737_v4 = vmul.f32 %v3873_v32, %v733_v59  ;;  %v1285_v60 = vrot.slane %v1284_v53, 1  ;;  %v1553_v8 = vadd.f32 %v1552_v61, %v1551_v28  ;;  %v2108_v33 = vrot.slane %v2107_v62, 2 }
0x145f   :  { %v736_v38 = vmul.f32 %v3873_v32, %v724_v1  ;;  %v1018_v6 = vadd.f32 %v1017_v26, %v1016_v46  ;;  %v1009_v49 = vadd.f32 %v1008_v11, %v1007_v50  ;;  %v2118_v40 = vadd.f32 %v2117_v9, %v2116_v58 }
0x1460   :  { %v3099_v10 = vpop.eup %3098  ;;  %v1554_v15 = vrot.slane %v1553_v8, 1  ;;  %v1288_v27 = vstv %s3877_s12  ;;  %v739_v50 = vadd.f32 %v737_v4, %v452_v29 }
0x1461   :  { %v3101_v48 = vpop.eup %3100  ;;  %v2355_v18 = vadd.f32 1.0, %v3099_v10  ;;  %v1544_v10 = vadd.f32 %v1543_v39, %v1542_v44  ;;  %v1022_v35 = vmul.f32 %v1020_v52, %v1018_v6  ;;  %v2119_v36 = vrot.slane %v2118_v40, 1 }
0x1462   :  { %v3103_v16 = vpop.eup %3102  ;;  %v2353_v17 = vadd.f32 1.0, %v3101_v48  ;;  %v1836_v48 = vadd.f32 %v1835_v30, %v1834_v25  ;;  %v1021_v45 = vmul.f32 %v1020_v52, %v1009_v49 }
0x1463   :  { %v3105_v3 = vpop.eup %3104  ;;  %3106 = vrcp.f32 %v2355_v18  ;;  %v2356_v22 = vadd.f32 1.0, %v3103_v16  ;;  %v1276_v18 = vrot.slane %v1275_v34, 1  ;;  %v1827_v16 = vadd.f32 %v1826_v55, %v1825_v31 }
0x1464   :  { %3108 = vrcp.f32 %v2353_v17  ;;  %v2354_v24 = vadd.f32 1.0, %v3105_v3  ;;  %v2109_v17 = vadd.f32 %v2108_v33, %v2107_v62  ;;  %v1024_v62 = vadd.f32 %v1022_v35, %v739_v50 }
0x1465   :  { %3110 = vrcp.f32 %v2356_v22  ;;  %v1828_v28 = vrot.slane %v1827_v16, 1  ;;  %v2120_v39 = vadd.f32 %v2119_v36, %v2118_v40 }
0x1466   :  { %3112 = vrcp.f32 %v2354_v24  ;;  %v1277_v24 = vadd.f32 %v1276_v18, %v1275_v34  ;;  %v2110_v47 = vrot.slane %v2109_v17, 1 }
0x1467   :  { %v1829_v59 = vadd.f32 %v1828_v28, %v1827_v16 }
0x1468   :  { %v1289_v58 = vmul.f32 %v1288_v27, %v1277_v24  ;;  %v2111_v34 = vadd.f32 %v2110_v47, %v2109_v17 }
0x146d   :  { %v3107_v57 = vpop.eup %3106 }
0x146e   :  { %v3109_v5 = vpop.eup %3108  ;;  %v2367_v0 = vmul.f32 %v3107_v57, %v3750_v63  ;;  %v1286_v63 = vadd.f32 %v1285_v60, %v1284_v53  ;;  %v738_v53 = vadd.f32 %v736_v38, %v451_v21  ;;  %v1839_v21 = vmul.f32 %v1829_v59, %v3873_v32 }
0x146f   :  { %v3111_v12 = vpop.eup %3110  ;;  %v2365_v7 = vmul.f32 %v3109_v5, %v3756_v42  ;;  %v1545_v42 = vrot.slane %v1544_v10, 1  ;;  %v2122_v5 = vmul.f32 %v2120_v39, %v1020_v52  ;;  %v2121_v38 = vmul.f32 %v2111_v34, %v1020_v52 }
0x1470   :  { %v3113_v37 = vpop.eup %3112  ;;  %v2368_v2 = vmul.f32 %v3111_v12, %v3753_v41  ;;  %v2378_v3 = vsel %vm111_vm1, %v2367_v0, 0.0  ;;  %v1837_v41 = vrot.slane %v1836_v48, 1  ;;  %v1290_v51 = vmul.f32 %v1288_v27, %v1286_v63 }
0x1471   :  { %v2366_v14 = vmul.f32 %v3113_v37, %v3759_v43  ;;  %v2369_v20 = vsel %vm111_vm1, %v2365_v7, 0.0  ;;  %v1555_v43 = vadd.f32 %v1554_v15, %v1553_v8  ;;  %v1546_v46 = vadd.f32 %v1545_v42, %v1544_v10 }
0x1472   :  { %v2379_v13 = vsel %vm111_vm1, %v2368_v2, 0.0  ;;  %v1838_v56 = vadd.f32 %v1837_v41, %v1836_v48  ;;  %v1023_v30 = vadd.f32 %v1021_v45, %v738_v53  ;;  %v1292_v57 = vadd.f32 %v1290_v51, %v1024_v62 }
0x1473   :  { %v2380_v22 = vadd.f32 %v2379_v13, %v2378_v3  ;;  %v2370_v19 = vsel %vm111_vm1, %v2366_v14, 0.0  ;;  %v1557_v1 = vmul.f32 %v1555_v43, %v3865_v54  ;;  %v1556_v11 = vmul.f32 %v1546_v46, %v3865_v54 }
0x1474   :  { %v2371_v23 = vadd.f32 %v2370_v19, %v2369_v20  ;;  %v1840_v29 = vmul.f32 %v1838_v56, %v3873_v32  ;;  %v1291_v4 = vadd.f32 %v1289_v58, %v1023_v30  ;;  %v2652_v32 = vld [vmem:[%s3920_s6] ss:$0 sm:$0xff]  ;;  %s3160_s6 = smov [#allocation5]  }
0x1475   :  { %v2381_v44 = vrot.slane %v2380_v22, 4  ;;  %v1559_v8 = vadd.f32 %v1557_v1, %v1292_v57  ;;  %s2496_s14 = sshll.u32 %s3160_s6, 4  ;;  %s2497_s14 = int_to_ptr.vmem [resolvable:$true] %s2496_s14 }
0x1476   :  { %v2372_v25 = vrot.slane %v2371_v23, 4  ;;  %v1558_v0 = vadd.f32 %v1556_v11, %v1291_v4  ;;  %s3130_s15 = scalar_lea.vmem %s2497_s14, 32  ;;  %p3135_p6 = scmp.lt.s32.totalorder %s2497_s14, %s2497_s14 }
0x1477   :  { %v2382_v31 = vadd.f32 %v2381_v44, %v2380_v22  ;;  %v1842_v12 = vadd.f32 %v1840_v29, %v1559_v8  ;;  %p3131_p5 = scmp.ne.s32.totalorder %s2497_s14, %s3130_s15  ;;  %p3136_p7 = scmp.lt.s32.totalorder %s3130_s15, %s3130_s15 }
0x1478   :  { %v2373_v61 = vadd.f32 %v2372_v25, %v2371_v23  ;;  %v1841_v7 = vadd.f32 %v1839_v21, %v1558_v0 }
0x1479   :  { %v2383_v26 = vrot.slane %v2382_v31, 2  ;;  %v2124_v48 = vadd.f32 %v2122_v5, %v1842_v12  ;;  %p3137_p8 = por %p3136_p7, %p3135_p6 }
0x147a   :  { %v2374_v55 = vrot.slane %v2373_v61, 2  ;;  %v2123_v49 = vadd.f32 %v2121_v38, %v1841_v7 }
0x147b   :  { %v2384_v9 = vadd.f32 %v2383_v26, %v2382_v31  ;;  %p3138_p9 = pnand %p3137_p8, %p3131_p5 }
0x147c   :  { %v2375_v60 = vadd.f32 %v2374_v55, %v2373_v61 }
0x147d   :  { %v2385_v33 = vrot.slane %v2384_v9, 1 }
0x147e   :  { %v2376_v10 = vrot.slane %v2375_v60, 1 }
0x147f   :  { %v2386_v6 = vadd.f32 %v2385_v33, %v2384_v9 }
0x1480   :  { %v2377_v54 = vadd.f32 %v2376_v10, %v2375_v60 }
0x1481   :  { %v2388_v37 = vmul.f32 %v2386_v6, %v1288_v27 }
0x1482   :  { %v2387_v2 = vmul.f32 %v2377_v54, %v1288_v27 }
0x1483   :  { %v2390_v18 = vadd.f32 %v2388_v37, %v2124_v48 }
0x1484   :  { %v2389_v16 = vadd.f32 %v2387_v2, %v2123_v49 }
0x1486   :  { %v2402_v40 = vsel %vm2401_vm6, %v2390_v18, %v2389_v16 }
0x1487   :  { %2812 = vmatmul.mubr.msk.f32.vlgmr.msra.gmra.mrb[32].mxu1 %vm111_vm1, %v2402_v40 }
0x155a   :  { %v2471_v52 = vpop.f32.mrb[32].mxu1 }
0x155b   :  { %v2472_v14 = vadd.f32 %v2652_v32, %v2471_v52  ;;  %v2813_v63 = vpop.f32.mrb[33].mxu1 }
0x155d   :  { %v2476_v15 = vsel %vm2475_vm7, %v2472_v14, -inf }
0x155e   :  { %2477 = vmax.xlane.f32.xlu0 %v2476_v15 }
0x15eb   :  { %v2478_v17 = vpop.xlane.xlu0 %2477 }
0x15ec   :  { %v2479_v3 = vsub.f32 %v2472_v14, %v2478_v17 }
0x15ee   :  { %v2480_v13 = vmul.f32 1.442695, %v2479_v3 }
0x15f0   :  { %3114 = vpow2.f32 %v2480_v13 }
0x15fa   :  { %v3115_v42 = vpop.eup %3114 }
0x15fb   :  { %v2482_v20 = vsel %vm2475_vm7, %v3115_v42, 0.0 }
0x15fc   :  { %2483 = vadd.xlane.f32.xlu1 %v2482_v20 }
0x1689   :  { %v2484_v22 = vpop.xlane.xlu1 %2483 }
0x168a   :  { %3116 = vlog2.f32 %v2484_v22 }
0x1694   :  { %v3117_v19 = vpop.eup %3116 }
0x1695   :  { %v2486_v41 = vmul.f32 0.6931472, %v3117_v19 }
0x1697   :  { %v2487_v23 = vadd.f32 %v2486_v41, %v2478_v17 }
0x1699   :  { %v2488_v24 = vsub.f32 %v2472_v14, %v2487_v23 }
0x169b   :  { %2489 = vst.msk [vmem:[#allocation5] sm:$0x3] %vm2475_vm7, %v2488_v24 }
0x169c   :  { %3141 = shalt.err (!%p3138_p9)
}
0x169d   :  { %s3142_s18 = scalar_lea.hbm %s3922_s8, 32 }
0x169e   :  { %p3143_p10 = scmp.ne.s32.totalorder %s3922_s8, %s3142_s18  ;;  %p3146_p11 = scmp.lt.u32.totalorder %s3142_s18, %s3922_s8 }
0x16a0   :  { %p3148_p12 = pnand %p3146_p11, %p3143_p10 }
0x16a2   :  { %3151 = shalt.err (!%p3148_p12)
}
0x16a3   :  { %2499 = dma.vmem_to_hbm [thread:$0]  %s2497_s14, 32, %s3922_s8, [#allocation3]  }
0x16a4   :  { %3154 = dma.done.wait [#allocation3], 32  }
0x16a5   :  { %3155 = vsyncadd [#allocation3], 4294967264 }
0x16a6   :  { %2503 = vsyncpa [#allocation3], 1 }
0x16a7   :  { %2504 = vsyncpa [#allocation4], 1 }

</bundles_post_ra>
